<compile_context>
chip_gen: v5e
topology: v5e:2x2
jax: 0.10.0
libtpu: 0.0.40
codegen_flags: <defaults>
</compile_context>

<pallas_src>
import numpy as np
import jax
import jax.numpy as jnp
from jax.experimental import pallas as pl
from jax.experimental.pallas import tpu as pltpu


# ------------------------------ fused kernel -------------------------------

def detail_kernel(x1_ref, x2_ref, m1t_ref, m2t_ref,
                  w1_ref, b1_ref, cw1_ref, cw2_ref,
                  w2_ref, b2_ref, w3_ref, b3_ref, o_ref):
    f32 = jnp.float32

    # ---- bilinear x2 upsample of high features: [C, HW] @ [HW, HW2] ----
    x1u = jnp.dot(x1_ref[0], m1t_ref[...], preferred_element_type=f32)

    # ---- conv1 (1x1, folded eval BN) + ReLU on low features ----
    x2c = jnp.maximum(
        jnp.dot(w1_ref[...], x2_ref[0], preferred_element_type=f32)
        + b1_ref[...], 0.0)                                   # [C, HW2]

    prod = x1u * x2c                                          # x1 * conv1(x2)

    # ---- ChannelAttention: avg/max pool over spatial + shared MLP ----
    avg = jnp.mean(prod, axis=-1, keepdims=True)              # [C, 1]
    mx = jnp.max(prod, axis=-1, keepdims=True)                # [C, 1]
    col = jax.lax.broadcasted_iota(jnp.int32, (1, 2), 1)
    pooled = jnp.where(col == 0, avg, mx)                     # [C, 2] (avg|max)
    h = jnp.maximum(
        jnp.dot(cw1_ref[...], pooled, preferred_element_type=f32), 0.0)
    att = jnp.dot(cw2_ref[...], h, preferred_element_type=f32)      # [C, 2]
    att = jax.nn.sigmoid(jnp.sum(att, axis=-1, keepdims=True))      # [C, 1]

    # residual + attended product
    fused = x1u + prod * att                                  # [C, HW2]

    # ---- second bilinear x2 upsample: [C, HW2] @ [HW2, HW4] ----
    up2 = jnp.dot(fused, m2t_ref[...], preferred_element_type=f32)  # [C, HW4]

    # ---- conv2 -> conv3 (1x1 + folded BN + ReLU), fused in-register ----
    y = jnp.maximum(
        jnp.dot(w2_ref[...], up2, preferred_element_type=f32) + b2_ref[...],
        0.0)
    y = jnp.maximum(
        jnp.dot(w3_ref[...], y, preferred_element_type=f32) + b3_ref[...],
        0.0)
    o_ref[0] = y.astype(o_ref.dtype)                          # lane-dense store


def detail_forward(x1_nchw, x2_nchw, p):
    B, C, H, W = x1_nchw.shape
    Cl, H2, W2 = x2_nchw.shape[1:]
    H4, W4 = 2 * H2, 2 * W2
    HW, HW2, HW4 = H * W, H2 * W2, H4 * W4
    Cr = p["cw1"].shape[0]

    # NCHW is already channels-major: flattening spatial is a free reshape.
    x1 = x1_nchw.reshape(B, C, HW)
    x2 = x2_nchw.reshape(B, Cl, HW2)

    out = pl.pallas_call(
        detail_kernel,
        out_shape=jax.ShapeDtypeStruct((B, C, HW4), x1_nchw.dtype),
        grid=(B,),
        in_specs=[
            pl.BlockSpec((1, C, HW), lambda b: (b, 0, 0)),    # x1 flat
            pl.BlockSpec((1, Cl, HW2), lambda b: (b, 0, 0)),  # x2 flat
            pl.BlockSpec((HW, HW2), lambda b: (0, 0)),        # interp mat 1
            pl.BlockSpec((HW2, HW4), lambda b: (0, 0)),       # interp mat 2
            pl.BlockSpec((C, Cl), lambda b: (0, 0)),          # conv1 w (folded)
            pl.BlockSpec((C, 1), lambda b: (0, 0)),           # conv1 b
            pl.BlockSpec((Cr, C), lambda b: (0, 0)),          # ca.fc1
            pl.BlockSpec((C, Cr), lambda b: (0, 0)),          # ca.fc2
            pl.BlockSpec((C, C), lambda b: (0, 0)),           # conv2 w
            pl.BlockSpec((C, 1), lambda b: (0, 0)),           # conv2 b
            pl.BlockSpec((C, C), lambda b: (0, 0)),           # conv3 w
            pl.BlockSpec((C, 1), lambda b: (0, 0)),           # conv3 b
        ],
        out_specs=pl.BlockSpec((1, C, HW4), lambda b: (b, 0, 0)),
        compiler_params=pltpu.CompilerParams(
            dimension_semantics=("parallel",)),
    )(x1, x2, p["m1t"], p["m2t"], p["w1f"], p["b1f"],
      p["cw1"], p["cw2"], p["w2f"], p["b2f"], p["w3f"], p["b3f"])

    # Free reshape back to NCHW (already channels-major).
    return out.reshape(B, C, H4, W4)


# ------------------------------ glue / params ------------------------------

def bilinear_matrix(in_size, out_size):
    """1-D bilinear interpolation matrix, align_corners=True."""
    A = np.zeros((out_size, in_size), dtype=np.float32)
    scale = (in_size - 1) / (out_size - 1) if out_size > 1 else 0.0
    for o in range(out_size):
        s = o * scale
        i0 = int(np.floor(s))
        i1 = min(i0 + 1, in_size - 1)
        f = s - i0
        A[o, i0] += 1.0 - f
        A[o, i1] += f
    return A


def fold_bn(w, gamma, beta, mean, var, eps=1e-5):
    """Fold eval-mode BatchNorm into a [Cout, Cin] 1x1-conv weight."""
    scale = gamma / jnp.sqrt(var + eps)
    return w * scale[:, None], (beta - mean * scale)[:, None]


# --------------------------- pure-JAX reference ----------------------------

def detail_reference(x1, x2, p):
    """Same math in NCHW with separable einsum upsampling (independent path)."""
    def up(x, ah, aw):
        return jnp.einsum("oh,pw,bchw->bcop", ah, aw, x)

    x1u = up(x1, p["ah1"], p["aw1"])
    x2c = jax.nn.relu(jnp.einsum("ol,blhw->bohw", p["w1f"], x2)
                      + p["b1f"][None, :, :, None])
    prod = x1u * x2c
    avg = prod.mean(axis=(2, 3), keepdims=True)
    mx = prod.max(axis=(2, 3), keepdims=True)

    def mlp(v):
        h = jax.nn.relu(jnp.einsum("rc,bcij->brij", p["cw1"], v))
        return jnp.einsum("cr,brij->bcij", p["cw2"], h)

    att = jax.nn.sigmoid(mlp(avg) + mlp(mx))
    out = x1u + prod * att
    up2 = up(out, p["ah2"], p["aw2"])
    y = jax.nn.relu(jnp.einsum("oc,bchw->bohw", p["w2f"], up2)
                    + p["b2f"][None, :, :, None])
    y = jax.nn.relu(jnp.einsum("oc,bchw->bohw", p["w3f"], y)
                    + p["b3f"][None, :, :, None])
    return y


# ---------------------------------- main -----------------------------------

if __name__ == "__main__":
    B, C, Cl, H, W = 2, 16, 8, 8, 8          # high_feature_channels=16, low=8
    Cr = C // 8

    key = jax.random.PRNGKey(0)
    ks = jax.random.split(key, 20)

    x1 = jax.random.normal(ks[0], (B, C, H, W), jnp.float32)            # high
    x2 = jax.random.normal(ks[1], (B, Cl, 2 * H, 2 * W), jnp.float32)   # low

    def bn_params(k0, k1, k2, k3, n):
        gamma = 1.0 + 0.1 * jax.random.normal(ks[k0], (n,), jnp.float32)
        beta = 0.1 * jax.random.normal(ks[k1], (n,), jnp.float32)
        mean = 0.05 * jax.random.normal(ks[k2], (n,), jnp.float32)
        var = 1.0 + 0.1 * jnp.abs(jax.random.normal(ks[k3], (n,), jnp.float32))
        return gamma, beta, mean, var

    # conv weights stored as [Cout, Cin] (torch [Cout, Cin, 1, 1] squeezed)
    w1 = 0.3 * jax.random.normal(ks[2], (C, Cl), jnp.float32)
    w2 = 0.3 * jax.random.normal(ks[3], (C, C), jnp.float32)
    w3 = 0.3 * jax.random.normal(ks[4], (C, C), jnp.float32)
    cw1 = 0.3 * jax.random.normal(ks[5], (Cr, C), jnp.float32)   # ca.fc1
    cw2 = 0.3 * jax.random.normal(ks[6], (C, Cr), jnp.float32)   # ca.fc2

    w1f, b1f = fold_bn(w1, *bn_params(7, 8, 9, 10, C))
    w2f, b2f = fold_bn(w2, *bn_params(11, 12, 13, 14, C))
    w3f, b3f = fold_bn(w3, *bn_params(15, 16, 17, 18, C))

    ah1 = bilinear_matrix(H, 2 * H)
    aw1 = bilinear_matrix(W, 2 * W)
    ah2 = bilinear_matrix(2 * H, 4 * H)
    aw2 = bilinear_matrix(2 * W, 4 * W)

    params = dict(
        # kernel-side interpolation matrices applied on the right: x @ M^T
        m1t=jnp.asarray(np.kron(ah1, aw1).T),    # [HW, 4HW]
        m2t=jnp.asarray(np.kron(ah2, aw2).T),    # [4HW, 16HW]
        # 1-D matrices for the reference path
        ah1=jnp.asarray(ah1), aw1=jnp.asarray(aw1),
        ah2=jnp.asarray(ah2), aw2=jnp.asarray(aw2),
        w1f=w1f, b1f=b1f, w2f=w2f, b2f=b2f, w3f=w3f, b3f=b3f,
        cw1=cw1, cw2=cw2,
    )

    out = jax.block_until_ready(detail_forward(x1, x2, params))
    ref = jax.block_until_ready(detail_reference(x1, x2, params))

    assert out.shape == (B, C, 4 * H, 4 * W), out.shape
    np.testing.assert_allclose(np.asarray(out), np.asarray(ref),
                               rtol=1e-4, atol=1e-4)
    print("KERNEL_OK")
</pallas_src>

<mosaic_0001>
module attributes {stable_mosaic.version = 11 : i64} {
  func.func @detail_kernel(%arg0: i32, %arg1: memref<1x16x64xf32, #tpu.memory_space<vmem>>, %arg2: memref<1x8x256xf32, #tpu.memory_space<vmem>>, %arg3: memref<64x256xf32, #tpu.memory_space<vmem>>, %arg4: memref<256x1024xf32, #tpu.memory_space<vmem>>, %arg5: memref<16x8xf32, #tpu.memory_space<vmem>>, %arg6: memref<16x1xf32, #tpu.memory_space<vmem>>, %arg7: memref<2x16xf32, #tpu.memory_space<vmem>>, %arg8: memref<16x2xf32, #tpu.memory_space<vmem>>, %arg9: memref<16x16xf32, #tpu.memory_space<vmem>>, %arg10: memref<16x1xf32, #tpu.memory_space<vmem>>, %arg11: memref<16x16xf32, #tpu.memory_space<vmem>>, %arg12: memref<16x1xf32, #tpu.memory_space<vmem>>, %arg13: memref<1x16x1024xf32, #tpu.memory_space<vmem>>) attributes {dimension_semantics = [#tpu.dimension_semantics<parallel>], iteration_bounds = array<i64: 2>, scalar_prefetch = 0 : i64, scratch_operands = 0 : i64, tpu.core_type = #tpu.core_type<tc>, window_params = [{transform_indices = @transform_0, window_bounds = array<i64: 1, 16, 64>}, {transform_indices = @transform_1, window_bounds = array<i64: 1, 8, 256>}, {pipeline_mode = #tpu.pipeline_mode<synchronous>, transform_indices = @transform_2, window_bounds = array<i64: 64, 256>}, {pipeline_mode = #tpu.pipeline_mode<synchronous>, transform_indices = @transform_3, window_bounds = array<i64: 256, 1024>}, {pipeline_mode = #tpu.pipeline_mode<synchronous>, transform_indices = @transform_4, window_bounds = array<i64: 16, 8>}, {pipeline_mode = #tpu.pipeline_mode<synchronous>, transform_indices = @transform_5, window_bounds = array<i64: 16, 1>}, {pipeline_mode = #tpu.pipeline_mode<synchronous>, transform_indices = @transform_6, window_bounds = array<i64: 2, 16>}, {pipeline_mode = #tpu.pipeline_mode<synchronous>, transform_indices = @transform_7, window_bounds = array<i64: 16, 2>}, {pipeline_mode = #tpu.pipeline_mode<synchronous>, transform_indices = @transform_8, window_bounds = array<i64: 16, 16>}, {pipeline_mode = #tpu.pipeline_mode<synchronous>, transform_indices = @transform_9, window_bounds = array<i64: 16, 1>}, {pipeline_mode = #tpu.pipeline_mode<synchronous>, transform_indices = @transform_10, window_bounds = array<i64: 16, 16>}, {pipeline_mode = #tpu.pipeline_mode<synchronous>, transform_indices = @transform_11, window_bounds = array<i64: 16, 1>}, {transform_indices = @transform_12, window_bounds = array<i64: 1, 16, 1024>}]} {
    %c0 = arith.constant 0 : index
    %c0_0 = arith.constant 0 : index
    %c0_1 = arith.constant 0 : index
    %0 = vector.load %arg1[%c0, %c0_0, %c0_1] : memref<1x16x64xf32, #tpu.memory_space<vmem>>, vector<1x16x64xf32>
    %1 = vector.shape_cast %0 : vector<1x16x64xf32> to vector<16x64xf32>
    %c0_2 = arith.constant 0 : index
    %c0_3 = arith.constant 0 : index
    %2 = vector.load %arg3[%c0_2, %c0_3] : memref<64x256xf32, #tpu.memory_space<vmem>>, vector<64x256xf32>
    %cst = arith.constant dense<0.000000e+00> : vector<16x256xf32>
    %3 = tpu.matmul %1, %2, %cst {dimension_numbers = #tpu.dot_dimension_numbers<[1], [0], [0], [1], [0, 0, 1, 1], [], []>} : vector<16x64xf32>, vector<64x256xf32>, vector<16x256xf32> -> vector<16x256xf32>
    %c0_4 = arith.constant 0 : index
    %c0_5 = arith.constant 0 : index
    %4 = vector.load %arg5[%c0_4, %c0_5] : memref<16x8xf32, #tpu.memory_space<vmem>>, vector<16x8xf32>
    %c0_6 = arith.constant 0 : index
    %c0_7 = arith.constant 0 : index
    %c0_8 = arith.constant 0 : index
    %5 = vector.load %arg2[%c0_6, %c0_7, %c0_8] : memref<1x8x256xf32, #tpu.memory_space<vmem>>, vector<1x8x256xf32>
    %6 = vector.shape_cast %5 : vector<1x8x256xf32> to vector<8x256xf32>
    %cst_9 = arith.constant dense<0.000000e+00> : vector<16x256xf32>
    %7 = tpu.matmul %4, %6, %cst_9 {dimension_numbers = #tpu.dot_dimension_numbers<[1], [0], [0], [1], [0, 0, 1, 1], [], []>} : vector<16x8xf32>, vector<8x256xf32>, vector<16x256xf32> -> vector<16x256xf32>
    %c0_10 = arith.constant 0 : index
    %c0_11 = arith.constant 0 : index
    %8 = vector.load %arg6[%c0_10, %c0_11] : memref<16x1xf32, #tpu.memory_space<vmem>>, vector<16x1xf32>
    %9 = vector.broadcast %8 : vector<16x1xf32> to vector<16x256xf32>
    %10 = arith.addf %7, %9 : vector<16x256xf32>
    %cst_12 = arith.constant 0.000000e+00 : f32
    %11 = vector.broadcast %cst_12 : f32 to vector<16x256xf32>
    %12 = arith.maximumf %10, %11 : vector<16x256xf32>
    %13 = arith.mulf %3, %12 : vector<16x256xf32>
    %cst_13 = arith.constant dense<0.000000e+00> : vector<16xf32>
    %14 = vector.multi_reduction <add>, %13, %cst_13 [1] : vector<16x256xf32> to vector<16xf32>
    %15 = vector.shape_cast %14 : vector<16xf32> to vector<16x1xf32>
    %cst_14 = arith.constant 2.560000e+02 : f32
    %16 = vector.broadcast %cst_14 : f32 to vector<16x1xf32>
    %17 = arith.divf %15, %16 : vector<16x1xf32>
    %cst_15 = arith.constant dense<0xFF800000> : vector<16xf32>
    %18 = vector.multi_reduction <maximumf>, %13, %cst_15 [1] : vector<16x256xf32> to vector<16xf32>
    %19 = vector.shape_cast %18 : vector<16xf32> to vector<16x1xf32>
    %20 = tpu.iota {dimensions = array<i32: 1>} : vector<1x2xi32>
    %c0_i32 = arith.constant 0 : i32
    %21 = vector.broadcast %c0_i32 : i32 to vector<1x2xi32>
    %22 = arith.cmpi eq, %20, %21 : vector<1x2xi32>
    %23 = vector.shape_cast %22 : vector<1x2xi1> to vector<1x2xi1>
    %24 = vector.broadcast %23 : vector<1x2xi1> to vector<16x2xi1>
    %25 = vector.shape_cast %17 : vector<16x1xf32> to vector<16x1xf32>
    %26 = vector.broadcast %25 : vector<16x1xf32> to vector<16x2xf32>
    %27 = vector.shape_cast %19 : vector<16x1xf32> to vector<16x1xf32>
    %28 = vector.broadcast %27 : vector<16x1xf32> to vector<16x2xf32>
    %29 = arith.select %24, %26, %28 : vector<16x2xi1>, vector<16x2xf32>
    %c0_16 = arith.constant 0 : index
    %c0_17 = arith.constant 0 : index
    %30 = vector.load %arg7[%c0_16, %c0_17] : memref<2x16xf32, #tpu.memory_space<vmem>>, vector<2x16xf32>
    %cst_18 = arith.constant dense<0.000000e+00> : vector<2x2xf32>
    %31 = tpu.matmul %30, %29, %cst_18 {dimension_numbers = #tpu.dot_dimension_numbers<[1], [0], [0], [1], [0, 0, 1, 1], [], []>} : vector<2x16xf32>, vector<16x2xf32>, vector<2x2xf32> -> vector<2x2xf32>
    %cst_19 = arith.constant 0.000000e+00 : f32
    %32 = vector.broadcast %cst_19 : f32 to vector<2x2xf32>
    %33 = arith.maximumf %31, %32 : vector<2x2xf32>
    %c0_20 = arith.constant 0 : index
    %c0_21 = arith.constant 0 : index
    %34 = vector.load %arg8[%c0_20, %c0_21] : memref<16x2xf32, #tpu.memory_space<vmem>>, vector<16x2xf32>
    %cst_22 = arith.constant dense<0.000000e+00> : vector<16x2xf32>
    %35 = tpu.matmul %34, %33, %cst_22 {dimension_numbers = #tpu.dot_dimension_numbers<[1], [0], [0], [1], [0, 0, 1, 1], [], []>} : vector<16x2xf32>, vector<2x2xf32>, vector<16x2xf32> -> vector<16x2xf32>
    %cst_23 = arith.constant dense<0.000000e+00> : vector<16xf32>
    %36 = vector.multi_reduction <add>, %35, %cst_23 [1] : vector<16x2xf32> to vector<16xf32>
    %37 = vector.shape_cast %36 : vector<16xf32> to vector<16x1xf32>
    %38 = arith.negf %37 : vector<16x1xf32>
    %39 = math.exp %38 : vector<16x1xf32>
    %cst_24 = arith.constant 1.000000e+00 : f32
    %40 = vector.broadcast %cst_24 : f32 to vector<16x1xf32>
    %41 = arith.addf %40, %39 : vector<16x1xf32>
    %42 = arith.divf %40, %41 : vector<16x1xf32>
    %43 = vector.broadcast %42 : vector<16x1xf32> to vector<16x256xf32>
    %44 = arith.mulf %13, %43 : vector<16x256xf32>
    %45 = arith.addf %3, %44 : vector<16x256xf32>
    %c0_25 = arith.constant 0 : index
    %c0_26 = arith.constant 0 : index
    %46 = vector.load %arg4[%c0_25, %c0_26] : memref<256x1024xf32, #tpu.memory_space<vmem>>, vector<256x1024xf32>
    %cst_27 = arith.constant dense<0.000000e+00> : vector<16x1024xf32>
    %47 = tpu.matmul %45, %46, %cst_27 {dimension_numbers = #tpu.dot_dimension_numbers<[1], [0], [0], [1], [0, 0, 1, 1], [], []>} : vector<16x256xf32>, vector<256x1024xf32>, vector<16x1024xf32> -> vector<16x1024xf32>
    %c0_28 = arith.constant 0 : index
    %c0_29 = arith.constant 0 : index
    %48 = vector.load %arg9[%c0_28, %c0_29] : memref<16x16xf32, #tpu.memory_space<vmem>>, vector<16x16xf32>
    %cst_30 = arith.constant dense<0.000000e+00> : vector<16x1024xf32>
    %49 = tpu.matmul %48, %47, %cst_30 {dimension_numbers = #tpu.dot_dimension_numbers<[1], [0], [0], [1], [0, 0, 1, 1], [], []>} : vector<16x16xf32>, vector<16x1024xf32>, vector<16x1024xf32> -> vector<16x1024xf32>
    %c0_31 = arith.constant 0 : index
    %c0_32 = arith.constant 0 : index
    %50 = vector.load %arg10[%c0_31, %c0_32] : memref<16x1xf32, #tpu.memory_space<vmem>>, vector<16x1xf32>
    %51 = vector.broadcast %50 : vector<16x1xf32> to vector<16x1024xf32>
    %52 = arith.addf %49, %51 : vector<16x1024xf32>
    %cst_33 = arith.constant 0.000000e+00 : f32
    %53 = vector.broadcast %cst_33 : f32 to vector<16x1024xf32>
    %54 = arith.maximumf %52, %53 : vector<16x1024xf32>
    %c0_34 = arith.constant 0 : index
    %c0_35 = arith.constant 0 : index
    %55 = vector.load %arg11[%c0_34, %c0_35] : memref<16x16xf32, #tpu.memory_space<vmem>>, vector<16x16xf32>
    %cst_36 = arith.constant dense<0.000000e+00> : vector<16x1024xf32>
    %56 = tpu.matmul %55, %54, %cst_36 {dimension_numbers = #tpu.dot_dimension_numbers<[1], [0], [0], [1], [0, 0, 1, 1], [], []>} : vector<16x16xf32>, vector<16x1024xf32>, vector<16x1024xf32> -> vector<16x1024xf32>
    %c0_37 = arith.constant 0 : index
    %c0_38 = arith.constant 0 : index
    %57 = vector.load %arg12[%c0_37, %c0_38] : memref<16x1xf32, #tpu.memory_space<vmem>>, vector<16x1xf32>
    %58 = vector.broadcast %57 : vector<16x1xf32> to vector<16x1024xf32>
    %59 = arith.addf %56, %58 : vector<16x1024xf32>
    %cst_39 = arith.constant 0.000000e+00 : f32
    %60 = vector.broadcast %cst_39 : f32 to vector<16x1024xf32>
    %61 = arith.maximumf %59, %60 : vector<16x1024xf32>
    %c0_40 = arith.constant 0 : index
    %c0_41 = arith.constant 0 : index
    %c0_42 = arith.constant 0 : index
    %62 = vector.load %arg13[%c0_40, %c0_41, %c0_42] : memref<1x16x1024xf32, #tpu.memory_space<vmem>>, vector<1x16x1024xf32>
    %63 = vector.shape_cast %62 : vector<1x16x1024xf32> to vector<16x1024xf32>
    %64 = vector.shape_cast %61 : vector<16x1024xf32> to vector<1x16x1024xf32>
    tpu.vector_store %arg13[%c0_40, %c0_41, %c0_42], %64 {strides = array<i32>} : memref<1x16x1024xf32, #tpu.memory_space<vmem>>, vector<1x16x1024xf32>,
    return
  }
  func.func @transform_0(%arg0: i32) -> (i32, i32, i32) {
    %c0_i32 = arith.constant 0 : i32
    %c0_i32_0 = arith.constant 0 : i32
    %c0_i32_1 = arith.constant 0 : i32
    return %arg0, %c0_i32, %c0_i32_0 : i32, i32, i32
  }
  func.func @transform_1(%arg0: i32) -> (i32, i32, i32) {
    %c0_i32 = arith.constant 0 : i32
    %c0_i32_0 = arith.constant 0 : i32
    %c0_i32_1 = arith.constant 0 : i32
    return %arg0, %c0_i32, %c0_i32_0 : i32, i32, i32
  }
  func.func @transform_2(%arg0: i32) -> (i32, i32) {
    %c0_i32 = arith.constant 0 : i32
    %c0_i32_0 = arith.constant 0 : i32
    %c0_i32_1 = arith.constant 0 : i32
    return %c0_i32, %c0_i32_0 : i32, i32
  }
  func.func @transform_3(%arg0: i32) -> (i32, i32) {
    %c0_i32 = arith.constant 0 : i32
    %c0_i32_0 = arith.constant 0 : i32
    %c0_i32_1 = arith.constant 0 : i32
    return %c0_i32, %c0_i32_0 : i32, i32
  }
  func.func @transform_4(%arg0: i32) -> (i32, i32) {
    %c0_i32 = arith.constant 0 : i32
    %c0_i32_0 = arith.constant 0 : i32
    %c0_i32_1 = arith.constant 0 : i32
    return %c0_i32, %c0_i32_0 : i32, i32
  }
  func.func @transform_5(%arg0: i32) -> (i32, i32) {
    %c0_i32 = arith.constant 0 : i32
    %c0_i32_0 = arith.constant 0 : i32
    %c0_i32_1 = arith.constant 0 : i32
    return %c0_i32, %c0_i32_0 : i32, i32
  }
  func.func @transform_6(%arg0: i32) -> (i32, i32) {
    %c0_i32 = arith.constant 0 : i32
    %c0_i32_0 = arith.constant 0 : i32
    %c0_i32_1 = arith.constant 0 : i32
    return %c0_i32, %c0_i32_0 : i32, i32
  }
  func.func @transform_7(%arg0: i32) -> (i32, i32) {
    %c0_i32 = arith.constant 0 : i32
    %c0_i32_0 = arith.constant 0 : i32
    %c0_i32_1 = arith.constant 0 : i32
    return %c0_i32, %c0_i32_0 : i32, i32
  }
  func.func @transform_8(%arg0: i32) -> (i32, i32) {
    %c0_i32 = arith.constant 0 : i32
    %c0_i32_0 = arith.constant 0 : i32
    %c0_i32_1 = arith.constant 0 : i32
    return %c0_i32, %c0_i32_0 : i32, i32
  }
  func.func @transform_9(%arg0: i32) -> (i32, i32) {
    %c0_i32 = arith.constant 0 : i32
    %c0_i32_0 = arith.constant 0 : i32
    %c0_i32_1 = arith.constant 0 : i32
    return %c0_i32, %c0_i32_0 : i32, i32
  }
  func.func @transform_10(%arg0: i32) -> (i32, i32) {
    %c0_i32 = arith.constant 0 : i32
    %c0_i32_0 = arith.constant 0 : i32
    %c0_i32_1 = arith.constant 0 : i32
    return %c0_i32, %c0_i32_0 : i32, i32
  }
  func.func @transform_11(%arg0: i32) -> (i32, i32) {
    %c0_i32 = arith.constant 0 : i32
    %c0_i32_0 = arith.constant 0 : i32
    %c0_i32_1 = arith.constant 0 : i32
    return %c0_i32, %c0_i32_0 : i32, i32
  }
  func.func @transform_12(%arg0: i32) -> (i32, i32, i32) {
    %c0_i32 = arith.constant 0 : i32
    %c0_i32_0 = arith.constant 0 : i32
    %c0_i32_1 = arith.constant 0 : i32
    return %arg0, %c0_i32, %c0_i32_0 : i32, i32, i32
  }
}

</mosaic_0001>

<bundles_post_ra>
// kernel: tpu_custom_call.1
= control target key start
LH: loop header
LB: loop body
LE: loop exit
PB: predicated region body
PF: predicated region fallthrough
CT: control target
= control target key end

     0   :  { %s2750_s0 = inlined_call_operand.vmem [shape: f32[2,16,64], index: 0, kind: input, shape index: {}]   ;;  %s2751_s1 = inlined_call_operand.vmem [shape: f32[2,8,256], index: 1, kind: input, shape index: {}]   ;;  %s2752_s2 = inlined_call_operand.hbm [shape: f32[64,256], index: 2, kind: input, shape index: {}]   ;;  %s2753_s3 = inlined_call_operand.hbm [shape: f32[256,1024], index: 3, kind: input, shape index: {}]   ;;  %s2754_s4 = inlined_call_operand.vmem [shape: f32[16,8], index: 4, kind: input, shape index: {}]   ;;  %s2755_s5 = inlined_call_operand.vmem [shape: f32[16,1], index: 5, kind: input, shape index: {}]   ;;  %s2756_s6 = inlined_call_operand.hbm [shape: f32[2,16], index: 6, kind: input, shape index: {}]   ;;  %s2757_s7 = inlined_call_operand.vmem [shape: f32[16,2], index: 7, kind: input, shape index: {}]   ;;  %s2758_s8 = inlined_call_operand.vmem [shape: f32[16,16], index: 8, kind: input, shape index: {}]   ;;  %s2759_s9 = inlined_call_operand.vmem [shape: f32[16,1], index: 9, kind: input, shape index: {}]   ;;  %s2760_s10 = inlined_call_operand.vmem [shape: f32[16,16], index: 10, kind: input, shape index: {}]   ;;  %s2761_s11 = inlined_call_operand.vmem [shape: f32[16,1], index: 11, kind: input, shape index: {}]   ;;  %s2762_s12 = inlined_call_operand.hbm [shape: f32[2,16,1024], index: 12, kind: output, shape index: {}]  }
   0x1   :  { %2768 = sst [smem:[#allocation17_spill]] %s2752_s2 }
   0x2   :  { %2769 = sst [smem:[#allocation18_spill]] %s2753_s3 }
   0x3   :  { %17 = vsyncpa [#allocation3], 0 }
   0x4   :  { %18 = vsyncpa [#allocation6], 0 }
   0x5   :  { %19 = vsyncpa [#allocation4], 0 }
   0x6   :  { %21 = vsyncpa [#allocation4 + $0x1], 0  ;;  %s2369_s21 = smov 0   ;;  %s2371_s22 = smov 0  }
   0x7   :  { %s2373_s23 = smov 0   ;;  %s2375_s24 = smov 0  }
   0x8 LB: > { %2770 = sst [smem:[#allocation12_spill]] %s2279_s21  ;;  %s2390_s25 = sadd.s32 4294967295, %s2291_s24   ;;  %s2291_s24 = sphi %s2375_s24, %s2785_s24   ;;  %s2287_s23 = sphi %s2373_s23, %s2787_s23   ;;  %s2283_s22 = sphi %s2371_s22, %s2789_s22   ;;  %s2279_s21 = sphi %s2369_s21, %s2788_s21  }
   0x9   : > { %2771 = sst [smem:[#allocation13_spill]] %s2287_s23  ;;  %s1971_s26 = sadd.s32 4294967294, %s2291_s24  }
   0xa   : > { %s2394_s27 = sadd.s32 1, %s2291_s24   ;;  %s296_s28 = sadd.s32 1, %s2287_s23 }
   0xb   : > { %2772 = sst [smem:[#allocation14_spill]] %s2394_s27  ;;  %s293_s29 = ssub.s32 %s2291_s24, %s2394_s27 }
   0xc   : > { %p306_p0 = scmp.ne.s32.totalorder %s2287_s23, %s2283_s22  ;;  %p294_p1 = scmp.eq.s32.totalorder %s293_s29, 0 }
   0xd   : > { %p307_p2 = scmp.eq.s32.totalorder %s2390_s25, 1  ;;  %p312_p3 = scmp.ne.s32.totalorder %s2283_s22, %s2279_s21 }
   0xe   : > { %p313_p4 = scmp.eq.s32.totalorder %s1971_s26, 1  ;;  %p1972_p7 = scmp.ge.s32.totalorder %s2291_s24, 1 }
   0xf   : > { %s2405_s30 = scalar_select %p294_p1, %s2287_s23, %s296_s28  }
  0x10   : > { %p2407_p5 = por %p307_p2, %p306_p0  ;;  %p2411_p6 = por %p313_p4, %p312_p3 }
  0x11   : > { %2773 = sst [smem:[#allocation15_spill]] %s2405_s30  ;;  %p320_p8 = scmp.lt.s32.totalorder %s2291_s24, 3 }
  0x12   : > { %s2775_s14 = scalar_select %p2411_p6, 1, 0 }
  0x13   : > { %p2068_p9 = scmp.eq.s32.totalorder %s2390_s25, 0  ;;  %p2418_p10 = pnand %p1972_p7, %p320_p8 }
  0x14   : > { %2776 = sst [smem:[#allocation16_spill]] %s2775_s14  ;;  %s2293_s19 = smov [#allocation5]  }
  0x15   : > { %s2778_s3 = sld [smem:[#allocation18_spill]]  ;;  %p2054_p11 = pneg %p2418_p10 }
  0x16   : > { %s347_s20 = sshll.u32 %s2293_s19, 4  ;;  %s2780_s2 = sld [smem:[#allocation17_spill]]  ;;  %s348_s20 = int_to_ptr.vmem [resolvable:$true] %s347_s20 }
  0x17   : > { %p2429_p12 = pnand %p2068_p9, %p2054_p11  ;;  %s2294_s16 = smov 1024  }
  0x18   : > { %s2295_s17 = smov 64   ;;  %s2297_s23 = smov 256  }
  0x19   : > { %s2298_s27 = smov 16   ;;  %s366_s28 = sshll.u32 %s2756_s6, 4  ;;  %s367_s28 = int_to_ptr.hbm [resolvable:$true] %s366_s28 }
  0x1a   : > { %s2299_s29 = smov [#allocation7]  }
  0x1b   : > { %s345_s18 = sshll.u32 %s2778_s3, 4  ;;  %s2296_s3 = smov [#allocation2]   ;;  %s346_s18 = int_to_ptr.hbm [resolvable:$true] %s345_s18 }
  0x1c   : > { %s331_s30 = sshll.u32 %s2780_s2, 4  ;;  %s333_s19 = sshll.u32 %s2296_s3, 4  ;;  %s332_s30 = int_to_ptr.hbm [resolvable:$true] %s331_s30  ;;  %s334_s19 = int_to_ptr.vmem [resolvable:$true] %s333_s19 }
  0x1d   : > { %2060 = dma.hbm_to_vmem [thread:$0]  (!%p2429_p12), %s346_s18, 32768, %s348_s20, [#allocation6], %s2294_s16, %s2294_s16, %s2295_s17  }
  0x1e   : > { %2057 = dma.hbm_to_vmem [thread:$0]  (!%p2429_p12), %s332_s30, 2048, %s334_s19, [#allocation3], %s2297_s23, %s2297_s23, %s2298_s27  }
  0x1f   : > { %s368_s2 = sshll.u32 %s2299_s29, 4  ;;  %412 = sbr.rel (%p2418_p10) target bundleno = 1257 (0x4e9), region = 68  ;;  %s369_s2 = int_to_ptr.vmem [resolvable:$true] %s368_s2 }
  0x20   : > { %2063 = dma.hbm_to_vmem [thread:$0]  (!%p2429_p12), %s367_s28, 32, %s369_s2, [#allocation6]  }
  0x24   : > { %2266 = dma.done.wait (%p2068_p9), [#allocation3], 2048  }
  0x25   : > { %2268 = vsyncadd (%p2068_p9), [#allocation3], 4294965248 }
  0x26   : > { %2270 = dma.done.wait (%p2068_p9), [#allocation6], 32800  }
  0x27   : > { %2272 = vsyncadd (%p2068_p9), [#allocation6], 4294934496  ;;  %p470_p13 = scmp.lt.s32.totalorder %s2390_s25, 1  ;;  %v2300_v0 = vmov 0   ;;  %v496_v1 = vld [vmem:[#allocation2 + $0x70] sm:$0xff]  ;;  %v497_v2 = vld [vmem:[#allocation2 + $0x78] sm:$0xff]  ;;  %v649_v56 = vlaneseq }
  0x28   : > { %2118 = vset.pattern.permute.xlu0 %v2300_v0  ;;  %2120 = vset.pattern.permute.xlu1 %v2300_v0  ;;  %v494_v3 = vld [vmem:[#allocation2 + $0x60] sm:$0xff]  ;;  %v495_v4 = vld [vmem:[#allocation2 + $0x68] sm:$0xff]  ;;  %v492_v5 = vld [vmem:[#allocation2 + $0x50] sm:$0xff]  ;;  %vm567_vm0 = vcmask 64512   ;;  %vm498_vm1 = vcmask 523264   ;;  %v2301_v51 = vmov 256.0  }
  0x29   : > { %s2457_s2 = scalar_select %p470_p13, %s2390_s25, 1  ;;  %2119 = vset.pattern.permute.xlu2 %v2300_v0  ;;  %513 = vmatpush.msra.mxu0 %v496_v1  ;;  %v493_v6 = vld [vmem:[#allocation2 + $0x58] sm:$0xff]  ;;  %v551_v9 = vld [vmem:[%s2754_s4] sm:$0xff]  ;;  %v491_v11 = vld [vmem:[#allocation2 + $0x48] sm:$0xff]  ;;  %2121 = vrcp.f32 %v2301_v51  ;;  %v650_v58 = vand.u32 127, %v649_v56  ;;  %vm657_vm4 = vcmask 130048  }
  0x2a   : > { %536 = vmatpush.msra.mxu1 %v497_v2  ;;  %v490_v10 = vld [vmem:[#allocation2 + $0x40] sm:$0xff]  ;;  %v488_v12 = vld [vmem:[#allocation2 + $0x30] sm:$0xff]  ;;  %v489_v13 = vld [vmem:[#allocation2 + $0x38] sm:$0xff]  ;;  %vm691_vm5 = vcmask 1041408   ;;  %vm684_vm6 = vcmask 15360   ;;  %s2039_s15 = sshll.u32 %s2390_s25, 7 }
  0x2b   : > { %s2037_s3 = sshll.u32 %s2457_s2, 4  ;;  %514 = vmatpush.msra.mxu0 %v494_v3  ;;  %v556_v14 = vld [vmem:[%s2755_s5 + $0x8] sm:$0xff]  ;;  %v486_v15 = vld [vmem:[#allocation2 + $0x20] sm:$0xff]  ;;  %v484_v17 = vld [vmem:[#allocation2 + $0x10] sm:$0xff]  ;;  %vm651_vm3 = vcmp.eq.s32.totalorder %v650_v58, 0  ;;  %s1862_s26 = scalar_lea.hbm %s2762_s12, %s2039_s15 }
  0x2c   : > { %s479_s27 = scalar_lea.vmem %s2751_s1, %s2037_s3  ;;  %537 = vmatpush.msra.mxu1 %v495_v4  ;;  %v487_v16 = vld [vmem:[#allocation2 + $0x28] sm:$0xff]  ;;  %564 = vperm.xlu0 %2118, %v556_v14   ;;  %v485_v18 = vld [vmem:[#allocation2 + $0x18] sm:$0xff]  ;;  %s474_s16 = scalar_lea.vmem %s2750_s0, %s2037_s3  ;;  %v482_v20 = vld [vmem:[#allocation2] sm:$0xff] }
  0x2d   : > { %v553_v7 = vld [vmem:[%s479_s27] sm:$0xff]  ;;  %v554_v8 = vld [vmem:[%s479_s27 + $0x8] sm:$0xff]  ;;  %515 = vmatpush.msra.mxu0 %v492_v5  ;;  %s467_s27 = sand.u32 1, %s2283_s22   ;;  %s1865_s17 = sshll.u32 %s1862_s26, 4  ;;  %s1866_s17 = int_to_ptr.hbm [resolvable:$true] %s1865_s17 }
  0x2e   : > { %589 = vmatpush.msra.mxu2 %v553_v7  ;;  %612 = vmatpush.msra.mxu3 %v554_v8  ;;  %v552_v19 = vld [vmem:[%s2754_s4 + $0x8] sm:$0xff]  ;;  %v480_v22 = vld [vmem:[%s474_s16] sm:$0xff]  ;;  %s1981_s30 = sshll.u32 %s467_s27, 7  ;;  %s1851_s25 = scalar_lea.sflag [#allocation4], %s467_s27 }
  0x2f   : > { %538 = vmatpush.msra.mxu1 %v493_v6  ;;  %1990 = vmatmul.msk.f32.vlgmr.msra.gmra.mxu2 %vm567_vm0, %v551_v9  ;;  %v483_v21 = vld [vmem:[#allocation2 + $0x8] sm:$0xff]  ;;  %v555_v23 = vld [vmem:[%s2755_s5] sm:$0xff]  ;;  %v2122_v52 = vpop.eup %2121  ;;  %s2698_s14 = scalar_lea.vmem [#allocation8], %s1981_s30  ;;  %s2235_s19 = sshra.s32 %s1866_s17, 4  ;;  %s2236_s19 = int_to_ptr.hbm [resolvable:$true] %s2235_s19 }
  0x30   : > { %1992 = vmatmul.msk.f32.vlgmr.msra.gmra.mxu3 %vm567_vm0, %v551_v9  ;;  %516 = vmatpush.msra.mxu0 %v490_v10  ;;  %v481_v24 = vld [vmem:[%s474_s16 + $0x8] sm:$0xff]  ;;  %v635_v53 = vmul.f32 256.0, %v2122_v52  ;;  %vm639_vm2 = vweird.f32 %v2122_v52  ;;  %v656_v3 = vld [vmem:[#allocation7] sm:$0x3]  ;;  %s1863_s16 = sshll.u32 %s2698_s14, 4  ;;  %s2237_s28 = scalar_lea.hbm %s2236_s19, 128  ;;  %s1864_s16 = int_to_ptr.vmem [resolvable:$true] %s1863_s16 }
  0x31   : > { %539 = vmatpush.msra.mxu1 %v491_v11  ;;  %v682_v7 = vld [vmem:[%s2757_s7] sm:$0xff]  ;;  %v683_v8 = vld [vmem:[%s2757_s7 + $0x8] sm:$0xff]  ;;  %p2238_p0 = scmp.ne.s32.totalorder %s2236_s19, %s2237_s28  ;;  %s2241_s3 = scalar_lea.hbm %s2762_s12, 256 }
  0x32   : > { %517 = vmatpush.msra.mxu0 %v488_v12  ;;  %v636_v54 = vsub.f32 1.0, %v635_v53  ;;  %v890_v9 = vld [vmem:[#allocation5 + $0x3c0] sm:$0xff]  ;;  %v891_v11 = vld [vmem:[#allocation5 + $0x3c8] sm:$0xff]  ;;  %p2242_p3 = scmp.lt.s32.totalorder %s2236_s19, %s2762_s12  ;;  %p2243_p4 = scmp.lt.s32.totalorder %s2241_s3, %s2237_s28 }
  0x33   : > { %540 = vmatpush.msra.mxu1 %v489_v13  ;;  %v1018_v10 = vld [vmem:[#allocation5 + $0x7c0] sm:$0xff]  ;;  %v1019_v12 = vld [vmem:[#allocation5 + $0x7c8] sm:$0xff]  ;;  %p2239_p1 = pnand %p2238_p0, %p2407_p5 }
  0x34   : > { %518 = vmatpush.msra.mxu0 %v486_v15  ;;  %559 = vperm.xlu0 %2118, %v555_v23   ;;  %v637_v55 = vmul.f32 %v2122_v52, %v636_v54  ;;  %v882_v13 = vld [vmem:[#allocation5 + $0x380] sm:$0xff]  ;;  %v883_v15 = vld [vmem:[#allocation5 + $0x388] sm:$0xff]  ;;  %p2244_p7 = por %p2243_p4, %p2242_p3 }
  0x35   : > { %541 = vmatpush.msra.mxu1 %v487_v16  ;;  %v1010_v14 = vld [vmem:[#allocation5 + $0x780] sm:$0xff]  ;;  %v1011_v16 = vld [vmem:[#allocation5 + $0x788] sm:$0xff]  ;;  %p2240_p2 = pneg %p2239_p1 }
  0x36   : > { %519 = vmatpush.msra.mxu0 %v484_v17  ;;  %v638_v57 = vadd.f32 %v2122_v52, %v637_v55  ;;  %v874_v17 = vld [vmem:[#allocation5 + $0x340] sm:$0xff]  ;;  %v867_v23 = vld [vmem:[#allocation5 + $0x308] sm:$0xff] }
  0x37   : > { %542 = vmatpush.msra.mxu1 %v485_v18  ;;  %1991 = vmatmul.msk.f32.gmra.mxu2 %vm567_vm0, %v552_v19  ;;  %v1002_v18 = vld [vmem:[#allocation5 + $0x740] sm:$0xff]  ;;  %v827_v51 = vld [vmem:[#allocation5 + $0x1c8] sm:$0xff]  ;;  %p2245_p8 = pnand %p2244_p7, %p2240_p2 }
  0x38   : > { %1993 = vmatmul.msk.f32.gmra.mxu3 %vm567_vm0, %v552_v19  ;;  %520 = vmatpush.msra.mxu0 %v482_v20  ;;  %v640_v59 = vsel %vm639_vm2, %v2122_v52, %v638_v57  ;;  %v875_v19 = vld [vmem:[#allocation5 + $0x348] sm:$0xff]  ;;  %v818_v53 = vld [vmem:[#allocation5 + $0x180] sm:$0xff] }
  0x39   : > { %543 = vmatpush.msra.mxu1 %v483_v21  ;;  %1986 = vmatmul.msk.f32.vlgmr.msra.gmra.mxu0 %vm498_vm1, %v480_v22  ;;  %v1003_v20 = vld [vmem:[#allocation5 + $0x748] sm:$0xff]  ;;  %v866_v21 = vld [vmem:[#allocation5 + $0x300] sm:$0xff] }
  0x3a   : > { %1988 = vmatmul.msk.f32.vlgmr.msra.gmra.mxu1 %vm498_vm1, %v480_v22  ;;  %1026 = vmatpush.msrb.mxu0 %v890_v9  ;;  %v994_v22 = vld [vmem:[#allocation5 + $0x700] sm:$0xff]  ;;  %v955_v52 = vld [vmem:[#allocation5 + $0x5c8] sm:$0xff] }
  0x3b   : > { %1049 = vmatpush.msrb.mxu1 %v1018_v10  ;;  %v946_v54 = vld [vmem:[#allocation5 + $0x580] sm:$0xff]  ;;  %v819_v55 = vld [vmem:[#allocation5 + $0x188] sm:$0xff] }
  0x3c   : > { %1027 = vmatpush.msrb.mxu0 %v882_v13  ;;  %v947_v56 = vld [vmem:[#allocation5 + $0x588] sm:$0xff]  ;;  %v810_v57 = vld [vmem:[#allocation5 + $0x140] sm:$0xff] }
  0x3d   : > { %1050 = vmatpush.msrb.mxu1 %v1010_v14  ;;  %v938_v58 = vld [vmem:[#allocation5 + $0x540] sm:$0xff]  ;;  %v787_v9 = vld [vmem:[#allocation5 + $0x88] sm:$0xff] }
  0x3e   : > { %1028 = vmatpush.msrb.mxu0 %v874_v17  ;;  %v915_v10 = vld [vmem:[#allocation5 + $0x488] sm:$0xff]  ;;  %v770_v17 = vld [vmem:[#allocation5] sm:$0xff] }
  0x3f   : > { %1051 = vmatpush.msrb.mxu1 %v1002_v18  ;;  %v779_v13 = vld [vmem:[#allocation5 + $0x48] sm:$0xff]  ;;  %v898_v18 = vld [vmem:[#allocation5 + $0x400] sm:$0xff] }
  0x40   : > { %1029 = vmatpush.msrb.mxu0 %v866_v21  ;;  %v907_v14 = vld [vmem:[#allocation5 + $0x448] sm:$0xff]  ;;  %v892_v21 = vld [vmem:[#allocation5 + $0x3d0] sm:$0xff] }
  0x41   : > { %1987 = vmatmul.msk.f32.gmra.mxu0 %vm498_vm1, %v481_v24  ;;  %1052 = vmatpush.msrb.mxu1 %v994_v22  ;;  %v1020_v22 = vld [vmem:[#allocation5 + $0x7d0] sm:$0xff] }
  0x42   : > { %1989 = vmatmul.msk.f32.gmra.mxu1 %vm498_vm1, %v481_v24  ;;  %v995_v24 = vld [vmem:[#allocation5 + $0x708] sm:$0xff] }
  0x9e   : > { %v565_v25 = vpop.permute.xlu0 %564 }
  0xa6   : > { %v560_v30 = vpop.permute.xlu0 %559 }
  0xb2   : > { %v591_v26 = vpop.f32.mrf.mxu2 }
  0xb3   : > { %v614_v27 = vpop.f32.mrf.mxu3  ;;  %v592_v35 = vadd.f32 %v591_v26, %v560_v30  ;;  %v986_v26 = vld [vmem:[#allocation5 + $0x6c0] sm:$0xff] }
  0xb4   : > { %v615_v36 = vadd.f32 %v614_v27, %v560_v30  ;;  %v859_v27 = vld [vmem:[#allocation5 + $0x2c8] sm:$0xff]  ;;  %1053 = vmatpush.msrb.mxu1 %v986_v26  ;;  %v1012_v26 = vld [vmem:[#allocation5 + $0x790] sm:$0xff] }
  0xb5   : > { %v620_v43 = vmax.f32 %v592_v35, 0.0  ;;  %v987_v30 = vld [vmem:[#allocation5 + $0x6c8] sm:$0xff]  ;;  %v842_v35 = vld [vmem:[#allocation5 + $0x240] sm:$0xff] }
  0xb6   : > { %v2486_v28 = vpop.f32.mrf.mxu0  ;;  %v621_v44 = vmax.f32 %v615_v36, 0.0  ;;  %v970_v36 = vld [vmem:[#allocation5 + $0x640] sm:$0xff] }
  0xb7   : > { %v2488_v29 = vpop.f32.mrf.mxu1  ;;  %v2505_v47 = vmul.f32 %v620_v43, %v2486_v28  ;;  %v834_v43 = vld [vmem:[#allocation5 + $0x200] sm:$0xff] }
  0xb8   : > { %v2508_v48 = vmul.f32 %v621_v44, %v2488_v29  ;;  %v962_v44 = vld [vmem:[#allocation5 + $0x600] sm:$0xff] }
  0xba   : > { %v594_v31 = vpop.f32.mrf.mxu2  ;;  %v643_v49 = vmax.f32 %v2505_v47, %v2508_v48  ;;  %v628_v50 = vadd.f32 %v2508_v48, %v2505_v47 }
  0xbb   : > { %v617_v32 = vpop.f32.mrf.mxu3  ;;  %v595_v33 = vadd.f32 %v594_v31, %v565_v25  ;;  %v850_v31 = vld [vmem:[#allocation5 + $0x280] sm:$0xff] }
  0xbc   : > { %v618_v34 = vadd.f32 %v617_v32, %v565_v25  ;;  %v858_v25 = vld [vmem:[#allocation5 + $0x2c0] sm:$0xff] }
  0xbd   : > { %v622_v37 = vmax.f32 %v595_v33, 0.0  ;;  %v978_v32 = vld [vmem:[#allocation5 + $0x680] sm:$0xff]  ;;  %1030 = vmatpush.msrb.mxu0 %v858_v25  ;;  %v851_v33 = vld [vmem:[#allocation5 + $0x288] sm:$0xff]  ;;  %v884_v25 = vld [vmem:[#allocation5 + $0x390] sm:$0xff] }
  0xbe   : > { %v623_v38 = vmax.f32 %v618_v34, 0.0  ;;  %v2490_v39 = vpop.f32.mrf.mxu0  ;;  %v979_v34 = vld [vmem:[#allocation5 + $0x688] sm:$0xff]  ;;  %1054 = vmatpush.msrb.mxu1 %v978_v32  ;;  %v1004_v32 = vld [vmem:[#allocation5 + $0x750] sm:$0xff] }
  0xbf   : > { %v2492_v40 = vpop.f32.mrf.mxu1  ;;  %v2495_v41 = vmul.f32 %v622_v37, %v2490_v39  ;;  %1031 = vmatpush.msrb.mxu0 %v850_v31  ;;  %v843_v37 = vld [vmem:[#allocation5 + $0x248] sm:$0xff]  ;;  %v876_v31 = vld [vmem:[#allocation5 + $0x350] sm:$0xff] }
  0xc0   : > { %v2498_v42 = vmul.f32 %v623_v38, %v2492_v40  ;;  %v971_v38 = vld [vmem:[#allocation5 + $0x648] sm:$0xff]  ;;  %1055 = vmatpush.msrb.mxu1 %v970_v36  ;;  %v996_v36 = vld [vmem:[#allocation5 + $0x710] sm:$0xff] }
  0xc1   : > { %1032 = vmatpush.msrb.mxu0 %v842_v35  ;;  %v868_v35 = vld [vmem:[#allocation5 + $0x310] sm:$0xff] }
  0xc2   : > { %v646_v45 = vmax.f32 %v2495_v41, %v2498_v42  ;;  %v631_v46 = vadd.f32 %v2498_v42, %v2495_v41  ;;  %1056 = vmatpush.msrb.mxu1 %v962_v44  ;;  %v988_v44 = vld [vmem:[#allocation5 + $0x6d0] sm:$0xff] }
  0xc3   : > { %1033 = vmatpush.msrb.mxu0 %v834_v43  ;;  %v860_v43 = vld [vmem:[#allocation5 + $0x2d0] sm:$0xff] }
  0xc4   : > { %647 = vmax.xlane.f32.xlu2 %v646_v45  ;;  %632 = vadd.xlane.f32.xlu1 %v631_v46  ;;  %v835_v45 = vld [vmem:[#allocation5 + $0x208] sm:$0xff] }
  0xc5   : > { %v963_v46 = vld [vmem:[#allocation5 + $0x608] sm:$0xff] }
  0xcc   : > { %644 = vmax.xlane.f32.xlu2 %v643_v49  ;;  %629 = vadd.xlane.f32.xlu1 %v628_v50  ;;  %v826_v49 = vld [vmem:[#allocation5 + $0x1c0] sm:$0xff] }
  0xcd   : > { %v954_v50 = vld [vmem:[#allocation5 + $0x5c0] sm:$0xff]  ;;  %1034 = vmatpush.msrb.mxu0 %v826_v49  ;;  %v852_v49 = vld [vmem:[#allocation5 + $0x290] sm:$0xff] }
  0xce   : > { %1057 = vmatpush.msrb.mxu1 %v954_v50  ;;  %v980_v50 = vld [vmem:[#allocation5 + $0x690] sm:$0xff] }
  0xcf   : > { %1035 = vmatpush.msrb.mxu0 %v818_v53  ;;  %v844_v53 = vld [vmem:[#allocation5 + $0x250] sm:$0xff] }
  0xd0   : > { %1058 = vmatpush.msrb.mxu1 %v946_v54  ;;  %v972_v54 = vld [vmem:[#allocation5 + $0x650] sm:$0xff] }
  0xd1   : > { %1036 = vmatpush.msrb.mxu0 %v810_v57  ;;  %v836_v57 = vld [vmem:[#allocation5 + $0x210] sm:$0xff] }
  0xd2   : > { %1059 = vmatpush.msrb.mxu1 %v938_v58  ;;  %v964_v58 = vld [vmem:[#allocation5 + $0x610] sm:$0xff] }
 0x137   : > { %v648_v60 = vpop.xlane.xlu2 %647  ;;  %v633_v61 = vpop.xlane.xlu1 %632 }
 0x138   : > { %v642_v62 = vmul.f32 %v640_v59, %v633_v61  ;;  %v802_v61 = vld [vmem:[#allocation5 + $0x100] sm:$0xff] }
 0x139   : > { %1037 = vmatpush.msrb.mxu0 %v802_v61  ;;  %v828_v61 = vld [vmem:[#allocation5 + $0x1d0] sm:$0xff] }
 0x13a   : > { %v655_v63 = vsel %vm651_vm3, %v642_v62, %v648_v60  ;;  %v939_v60 = vld [vmem:[#allocation5 + $0x548] sm:$0xff]  ;;  %v930_v62 = vld [vmem:[#allocation5 + $0x500] sm:$0xff] }
 0x13b   : > { %675 = vmatpush.msrb.mxu2 %v655_v63  ;;  %v803_v63 = vld [vmem:[#allocation5 + $0x108] sm:$0xff]  ;;  %1060 = vmatpush.msrb.mxu1 %v930_v62  ;;  %v956_v62 = vld [vmem:[#allocation5 + $0x5d0] sm:$0xff] }
 0x13f   : > { %v630_v0 = vpop.xlane.xlu1 %629  ;;  %v645_v2 = vpop.xlane.xlu2 %644 }
 0x140   : > { %v641_v1 = vmul.f32 %v640_v59, %v630_v0  ;;  %v811_v59 = vld [vmem:[#allocation5 + $0x148] sm:$0xff] }
 0x142   : > { %v654_v4 = vsel %vm651_vm3, %v641_v1, %v645_v2  ;;  %v931_v1 = vld [vmem:[#allocation5 + $0x508] sm:$0xff]  ;;  %v794_v2 = vld [vmem:[#allocation5 + $0xc0] sm:$0xff] }
 0x143   : > { %676 = vmatpush.msrb.mxu2 %v654_v4  ;;  %v922_v4 = vld [vmem:[#allocation5 + $0x4c0] sm:$0xff]  ;;  %1038 = vmatpush.msrb.mxu0 %v794_v2  ;;  %v948_v2 = vld [vmem:[#allocation5 + $0x590] sm:$0xff] }
 0x144   : > { %1994 = vmatmul.msk.f32.vlgmr.msrb.gmra.mxu2 %vm657_vm4, %v656_v3  ;;  %1061 = vmatpush.msrb.mxu1 %v922_v4  ;;  %v949_v4 = vld [vmem:[#allocation5 + $0x598] sm:$0xff] }
 0x145   : > { %1072 = vmatpush.msra.mxu2 %v891_v11  ;;  %v778_v11 = vld [vmem:[#allocation5 + $0x40] sm:$0xff] }
 0x147   : > { %1073 = vmatpush.msra.mxu2 %v883_v15 }
 0x149   : > { %1074 = vmatpush.msra.mxu2 %v875_v19  ;;  %v771_v19 = vld [vmem:[#allocation5 + $0x8] sm:$0xff] }
 0x14b   : > { %1075 = vmatpush.msra.mxu2 %v867_v23  ;;  %v893_v23 = vld [vmem:[#allocation5 + $0x3d8] sm:$0xff] }
 0x14d   : > { %1076 = vmatpush.msra.mxu2 %v859_v27  ;;  %v885_v27 = vld [vmem:[#allocation5 + $0x398] sm:$0xff] }
 0x14f   : > { %1077 = vmatpush.msra.mxu2 %v851_v33  ;;  %v877_v33 = vld [vmem:[#allocation5 + $0x358] sm:$0xff] }
 0x151   : > { %1078 = vmatpush.msra.mxu2 %v843_v37  ;;  %v869_v37 = vld [vmem:[#allocation5 + $0x318] sm:$0xff] }
 0x153   : > { %1079 = vmatpush.msra.mxu2 %v835_v45  ;;  %v861_v45 = vld [vmem:[#allocation5 + $0x2d8] sm:$0xff] }
 0x155   : > { %1080 = vmatpush.msra.mxu2 %v827_v51  ;;  %v853_v51 = vld [vmem:[#allocation5 + $0x298] sm:$0xff] }
 0x157   : > { %1081 = vmatpush.msra.mxu2 %v819_v55  ;;  %v845_v55 = vld [vmem:[#allocation5 + $0x258] sm:$0xff] }
 0x159   : > { %1082 = vmatpush.msra.mxu2 %v811_v59  ;;  %v837_v59 = vld [vmem:[#allocation5 + $0x218] sm:$0xff] }
 0x15b   : > { %1083 = vmatpush.msra.mxu2 %v803_v63  ;;  %v829_v63 = vld [vmem:[#allocation5 + $0x1d8] sm:$0xff] }
 0x1c7   : > { %v678_v5 = vpop.f32.mrf.mxu2 }
 0x1c8   : > { %v681_v6 = vmax.f32 %v678_v5, 0.0  ;;  %v795_v5 = vld [vmem:[#allocation5 + $0xc8] sm:$0xff] }
 0x1c9   : > { %1084 = vmatpush.msra.mxu2 %v795_v5  ;;  %v812_v5 = vld [vmem:[#allocation5 + $0x150] sm:$0xff] }
 0x1ca   : > { %1995 = vmatpush.msk.msrb.mxu3 %vm691_vm5, %v681_v6  ;;  %v923_v6 = vld [vmem:[#allocation5 + $0x4c8] sm:$0xff] }
 0x1cb   : > { %1996 = vmatmul.msk.f32.vlgmr.msrb.gmra.mxu3 %vm684_vm6, %v682_v7  ;;  %v786_v7 = vld [vmem:[#allocation5 + $0x80] sm:$0xff]  ;;  %1085 = vmatpush.msra.mxu2 %v787_v9  ;;  %v804_v9 = vld [vmem:[#allocation5 + $0x110] sm:$0xff] }
 0x1cc   : > { %1095 = vmatpush.msra.mxu3 %v1019_v12  ;;  %1039 = vmatpush.msrb.mxu0 %v786_v7  ;;  %v906_v12 = vld [vmem:[#allocation5 + $0x440] sm:$0xff]  ;;  %v813_v7 = vld [vmem:[#allocation5 + $0x158] sm:$0xff] }
 0x1cd   : > { %1086 = vmatpush.msra.mxu2 %v779_v13  ;;  %v796_v13 = vld [vmem:[#allocation5 + $0xd0] sm:$0xff] }
 0x1ce   : > { %1096 = vmatpush.msra.mxu3 %v1011_v16  ;;  %1040 = vmatpush.msrb.mxu0 %v778_v11  ;;  %v805_v11 = vld [vmem:[#allocation5 + $0x118] sm:$0xff] }
 0x1cf   : > { %1087 = vmatpush.msra.mxu2 %v771_v19  ;;  %v789_v19 = vld [vmem:[#allocation5 + $0x98] sm:$0xff] }
 0x1d0   : > { %1097 = vmatpush.msra.mxu3 %v1003_v20  ;;  %1041 = vmatpush.msrb.mxu0 %v770_v17  ;;  %v899_v20 = vld [vmem:[#allocation5 + $0x408] sm:$0xff]  ;;  %v788_v17 = vld [vmem:[#allocation5 + $0x90] sm:$0xff] }
 0x1d1   : > { %1164 = vmatpush.msrb.mxu2 %v893_v23  ;;  %v781_v23 = vld [vmem:[#allocation5 + $0x58] sm:$0xff] }
 0x1d2   : > { %1098 = vmatpush.msra.mxu3 %v995_v24  ;;  %v1021_v24 = vld [vmem:[#allocation5 + $0x7d8] sm:$0xff]  ;;  %1118 = vmatpush.msra.mxu0 %v892_v21  ;;  %v780_v21 = vld [vmem:[#allocation5 + $0x50] sm:$0xff] }
 0x1d3   : > { %1997 = vmatmul.msk.f32.gmra.mxu3 %vm684_vm6, %v683_v8  ;;  %v914_v8 = vld [vmem:[#allocation5 + $0x480] sm:$0xff]  ;;  %1165 = vmatpush.msrb.mxu2 %v885_v27  ;;  %v773_v27 = vld [vmem:[#allocation5 + $0x18] sm:$0xff] }
 0x1d4   : > { %1099 = vmatpush.msra.mxu3 %v987_v30  ;;  %1062 = vmatpush.msrb.mxu1 %v914_v8  ;;  %v1013_v30 = vld [vmem:[#allocation5 + $0x798] sm:$0xff] }
 0x1d5   : > { %1119 = vmatpush.msra.mxu0 %v884_v25  ;;  %1166 = vmatpush.msrb.mxu2 %v877_v33  ;;  %v941_v8 = vld [vmem:[#allocation5 + $0x558] sm:$0xff]  ;;  %v772_v25 = vld [vmem:[#allocation5 + $0x10] sm:$0xff] }
 0x1d6   : > { %1100 = vmatpush.msra.mxu3 %v979_v34  ;;  %1063 = vmatpush.msrb.mxu1 %v906_v12  ;;  %v1005_v34 = vld [vmem:[#allocation5 + $0x758] sm:$0xff] }
 0x1d7   : > { %1120 = vmatpush.msra.mxu0 %v876_v31  ;;  %1167 = vmatpush.msrb.mxu2 %v869_v37  ;;  %v933_v12 = vld [vmem:[#allocation5 + $0x518] sm:$0xff] }
 0x1d8   : > { %1101 = vmatpush.msra.mxu3 %v971_v38  ;;  %1064 = vmatpush.msrb.mxu1 %v898_v18  ;;  %v997_v38 = vld [vmem:[#allocation5 + $0x718] sm:$0xff]  ;;  %v916_v18 = vld [vmem:[#allocation5 + $0x490] sm:$0xff] }
 0x1d9   : > { %1121 = vmatpush.msra.mxu0 %v868_v35  ;;  %1168 = vmatpush.msrb.mxu2 %v861_v45  ;;  %v901_v31 = vld [vmem:[#allocation5 + $0x418] sm:$0xff] }
 0x1da   : > { %1102 = vmatpush.msra.mxu3 %v963_v46  ;;  %1141 = vmatpush.msra.mxu1 %v1020_v22  ;;  %v989_v46 = vld [vmem:[#allocation5 + $0x6d8] sm:$0xff]  ;;  %v908_v22 = vld [vmem:[#allocation5 + $0x450] sm:$0xff] }
 0x1db   : > { %1122 = vmatpush.msra.mxu0 %v860_v43  ;;  %1169 = vmatpush.msrb.mxu2 %v853_v51 }
 0x1dc   : > { %1103 = vmatpush.msra.mxu3 %v955_v52  ;;  %1142 = vmatpush.msra.mxu1 %v1012_v26  ;;  %v981_v52 = vld [vmem:[#allocation5 + $0x698] sm:$0xff]  ;;  %v900_v26 = vld [vmem:[#allocation5 + $0x410] sm:$0xff] }
 0x1dd   : > { %1123 = vmatpush.msra.mxu0 %v852_v49  ;;  %1170 = vmatpush.msrb.mxu2 %v845_v55 }
 0x1de   : > { %1104 = vmatpush.msra.mxu3 %v947_v56  ;;  %1143 = vmatpush.msra.mxu1 %v1004_v32  ;;  %v973_v56 = vld [vmem:[#allocation5 + $0x658] sm:$0xff] }
 0x1df   : > { %1124 = vmatpush.msra.mxu0 %v844_v53  ;;  %1171 = vmatpush.msrb.mxu2 %v837_v59 }
 0x1e0   : > { %1105 = vmatpush.msra.mxu3 %v939_v60  ;;  %1144 = vmatpush.msra.mxu1 %v996_v36  ;;  %v965_v60 = vld [vmem:[#allocation5 + $0x618] sm:$0xff] }
 0x1e1   : > { %1125 = vmatpush.msra.mxu0 %v836_v57  ;;  %1172 = vmatpush.msrb.mxu2 %v829_v63 }
 0x1e2   : > { %1106 = vmatpush.msra.mxu3 %v931_v1  ;;  %1145 = vmatpush.msra.mxu1 %v988_v44  ;;  %v820_v1 = vld [vmem:[#allocation5 + $0x190] sm:$0xff] }
 0x1e3   : > { %1126 = vmatpush.msra.mxu0 %v828_v61 }
 0x1e4   : > { %1107 = vmatpush.msra.mxu3 %v923_v6  ;;  %1146 = vmatpush.msra.mxu1 %v980_v50  ;;  %v940_v6 = vld [vmem:[#allocation5 + $0x550] sm:$0xff] }
 0x1e5   : > { %1127 = vmatpush.msra.mxu0 %v820_v1  ;;  %v918_v1 = vld [vmem:[#allocation5 + $0x4a0] sm:$0xff] }
 0x1e6   : > { %1108 = vmatpush.msra.mxu3 %v915_v10  ;;  %1147 = vmatpush.msra.mxu1 %v972_v54  ;;  %v932_v10 = vld [vmem:[#allocation5 + $0x510] sm:$0xff] }
 0x1e7   : > { %1128 = vmatpush.msra.mxu0 %v812_v5 }
 0x1e8   : > { %1109 = vmatpush.msra.mxu3 %v907_v14  ;;  %1148 = vmatpush.msra.mxu1 %v964_v58  ;;  %v924_v14 = vld [vmem:[#allocation5 + $0x4d0] sm:$0xff] }
 0x1e9   : > { %1129 = vmatpush.msra.mxu0 %v804_v9 }
 0x1ea   : > { %1110 = vmatpush.msra.mxu3 %v899_v20  ;;  %1149 = vmatpush.msra.mxu1 %v956_v62  ;;  %v917_v20 = vld [vmem:[#allocation5 + $0x498] sm:$0xff] }
 0x1eb   : > { %1130 = vmatpush.msra.mxu0 %v796_v13 }
 0x1ec   : > { %1187 = vmatpush.msrb.mxu3 %v1021_v24  ;;  %1150 = vmatpush.msra.mxu1 %v948_v2  ;;  %v909_v24 = vld [vmem:[#allocation5 + $0x458] sm:$0xff] }
 0x1ed   : > { %1131 = vmatpush.msra.mxu0 %v788_v17  ;;  %v998_v17 = vld [vmem:[#allocation5 + $0x720] sm:$0xff] }
 0x1ee   : > { %1188 = vmatpush.msrb.mxu3 %v1013_v30  ;;  %1151 = vmatpush.msra.mxu1 %v940_v6 }
 0x1ef   : > { %1132 = vmatpush.msra.mxu0 %v780_v21  ;;  %v990_v21 = vld [vmem:[#allocation5 + $0x6e0] sm:$0xff] }
 0x1f0   : > { %1189 = vmatpush.msrb.mxu3 %v1005_v34  ;;  %1152 = vmatpush.msra.mxu1 %v932_v10  ;;  %v878_v10 = vld [vmem:[#allocation5 + $0x360] sm:$0xff] }
 0x1f1   : > { %1133 = vmatpush.msra.mxu0 %v772_v25  ;;  %v983_v25 = vld [vmem:[#allocation5 + $0x6a8] sm:$0xff] }
 0x1f2   : > { %1190 = vmatpush.msrb.mxu3 %v997_v38  ;;  %1153 = vmatpush.msra.mxu1 %v924_v14  ;;  %v879_v14 = vld [vmem:[#allocation5 + $0x368] sm:$0xff] }
 0x1f4   : > { %1191 = vmatpush.msrb.mxu3 %v989_v46  ;;  %1154 = vmatpush.msra.mxu1 %v916_v18 }
 0x1f6   : > { %1192 = vmatpush.msrb.mxu3 %v981_v52  ;;  %1155 = vmatpush.msra.mxu1 %v908_v22  ;;  %v991_v22 = vld [vmem:[#allocation5 + $0x6e8] sm:$0xff] }
 0x1f8   : > { %1193 = vmatpush.msrb.mxu3 %v973_v56  ;;  %1156 = vmatpush.msra.mxu1 %v900_v26  ;;  %v846_v26 = vld [vmem:[#allocation5 + $0x260] sm:$0xff] }
 0x1fa   : > { %1194 = vmatpush.msrb.mxu3 %v965_v60 }
 0x24e   : > { %v712_v0 = vpop.f32.mrf.mxu3 }
 0x24f   : > { %v718_v3 = vsel %vm684_vm6, %v712_v0, 0.0  ;;  %v957_v0 = vld [vmem:[#allocation5 + $0x5d8] sm:$0xff] }
 0x250   : > { %719 = vadd.xlane.f32.xlu0 %v718_v3  ;;  %v821_v3 = vld [vmem:[#allocation5 + $0x198] sm:$0xff]  ;;  %1195 = vmatpush.msrb.mxu3 %v957_v0 }
 0x251   : > { %1173 = vmatpush.msrb.mxu2 %v821_v3  ;;  %v894_v3 = vld [vmem:[#allocation5 + $0x3e0] sm:$0xff] }
 0x252   : > { %1196 = vmatpush.msrb.mxu3 %v949_v4  ;;  %v1022_v4 = vld [vmem:[#allocation5 + $0x7e0] sm:$0xff] }
 0x253   : > { %1174 = vmatpush.msrb.mxu2 %v813_v7  ;;  %v887_v7 = vld [vmem:[#allocation5 + $0x3a8] sm:$0xff] }
 0x254   : > { %1197 = vmatpush.msrb.mxu3 %v941_v8  ;;  %v1015_v8 = vld [vmem:[#allocation5 + $0x7a8] sm:$0xff] }
 0x255   : > { %1175 = vmatpush.msrb.mxu2 %v805_v11  ;;  %v1006_v11 = vld [vmem:[#allocation5 + $0x760] sm:$0xff] }
 0x256   : > { %v715_v15 = vpop.f32.mrf.mxu3  ;;  %1198 = vmatpush.msrb.mxu3 %v933_v12 }
 0x257   : > { %v721_v16 = vsel %vm684_vm6, %v715_v15, 0.0  ;;  %v797_v15 = vld [vmem:[#allocation5 + $0xd8] sm:$0xff] }
 0x258   : > { %722 = vadd.xlane.f32.xlu1 %v721_v16  ;;  %v925_v16 = vld [vmem:[#allocation5 + $0x4d8] sm:$0xff]  ;;  %1176 = vmatpush.msrb.mxu2 %v797_v15  ;;  %v1007_v15 = vld [vmem:[#allocation5 + $0x768] sm:$0xff] }
 0x259   : > { %1199 = vmatpush.msrb.mxu3 %v925_v16  ;;  %v870_v16 = vld [vmem:[#allocation5 + $0x320] sm:$0xff] }
 0x25a   : > { %1177 = vmatpush.msrb.mxu2 %v789_v19 }
 0x25b   : > { %1200 = vmatpush.msrb.mxu3 %v917_v20  ;;  %v871_v20 = vld [vmem:[#allocation5 + $0x328] sm:$0xff] }
 0x25c   : > { %1178 = vmatpush.msrb.mxu2 %v781_v23  ;;  %v982_v23 = vld [vmem:[#allocation5 + $0x6a0] sm:$0xff] }
 0x25d   : > { %1201 = vmatpush.msrb.mxu3 %v909_v24  ;;  %v855_v24 = vld [vmem:[#allocation5 + $0x2a8] sm:$0xff] }
 0x25e   : > { %1179 = vmatpush.msrb.mxu2 %v773_v27  ;;  %v974_v27 = vld [vmem:[#allocation5 + $0x660] sm:$0xff] }
 0x25f   : > { %1202 = vmatpush.msrb.mxu3 %v901_v31  ;;  %v975_v31 = vld [vmem:[#allocation5 + $0x668] sm:$0xff] }
 0x2c3   : > { %v720_v30 = vpop.xlane.xlu0 %719 }
 0x2c4   : > { %v1998_v32 = vmul.f32 -1.442695, %v720_v30  ;;  %v847_v30 = vld [vmem:[#allocation5 + $0x268] sm:$0xff] }
 0x2c6   : > { %2123 = vpow2.f32 %v1998_v32  ;;  %v838_v32 = vld [vmem:[#allocation5 + $0x220] sm:$0xff] }
 0x2cb   : > { %v723_v33 = vpop.xlane.xlu1 %722 }
 0x2cc   : > { %v2124_v34 = vpop.eup %2123  ;;  %v1999_v35 = vmul.f32 -1.442695, %v723_v33  ;;  %v966_v33 = vld [vmem:[#allocation5 + $0x620] sm:$0xff] }
 0x2cd   : > { %v730_v36 = vadd.f32 1.0, %v2124_v34  ;;  %v839_v34 = vld [vmem:[#allocation5 + $0x228] sm:$0xff] }
 0x2ce   : > { %2125 = vpow2.f32 %v1999_v35  ;;  %v967_v35 = vld [vmem:[#allocation5 + $0x628] sm:$0xff] }
 0x2cf   : > { %2127 = vrcp.f32 %v730_v36  ;;  %v743_v46 = vand.u32 2147483648, %v730_v36  ;;  %v741_v50 = vand.u32 2147483647, %v730_v36  ;;  %vm737_vm8 = vweird.f32 %v730_v36 }
 0x2d1   : > { %v744_v53 = vor.u32 1.1754944e-38, %v743_v46  ;;  %vm742_vm10 = vcmp.eq.f32.partialorder %v741_v50, 8.507059e+37  ;;  %v823_v46 = vld [vmem:[#allocation5 + $0x1a8] sm:$0xff]  ;;  %v814_v50 = vld [vmem:[#allocation5 + $0x160] sm:$0xff] }
 0x2d4   : > { %v2126_v37 = vpop.eup %2125 }
 0x2d5   : > { %v2128_v38 = vpop.eup %2127  ;;  %v731_v43 = vadd.f32 1.0, %v2126_v37  ;;  %v958_v37 = vld [vmem:[#allocation5 + $0x5e0] sm:$0xff] }
 0x2d6   : > { %v733_v44 = vmul.f32 %v2128_v38, %v730_v36  ;;  %vm738_vm7 = vweird.f32 %v2128_v38  ;;  %v830_v36 = vld [vmem:[#allocation5 + $0x1e0] sm:$0xff] }
 0x2d7   : > { %2129 = vrcp.f32 %v731_v43  ;;  %vm739_vm9 = vmor %vm737_vm8, %vm738_vm7  ;;  %vm752_vm11 = vweird.f32 %v731_v43  ;;  %v756_v57 = vand.u32 2147483647, %v731_v43  ;;  %v758_v58 = vand.u32 2147483648, %v731_v43 }
 0x2d8   : > { %v734_v45 = vsub.f32 1.0, %v733_v44  ;;  %v822_v44 = vld [vmem:[#allocation5 + $0x1a0] sm:$0xff] }
 0x2d9   : > { %v759_v2 = vor.u32 1.1754944e-38, %v758_v58  ;;  %vm757_vm14 = vcmp.eq.f32.partialorder %v756_v57, 8.507059e+37  ;;  %v935_v57 = vld [vmem:[#allocation5 + $0x528] sm:$0xff]  ;;  %v798_v58 = vld [vmem:[#allocation5 + $0xe0] sm:$0xff] }
 0x2da   : > { %v735_v49 = vmul.f32 %v2128_v38, %v734_v45  ;;  %v950_v45 = vld [vmem:[#allocation5 + $0x5a0] sm:$0xff] }
 0x2dc   : > { %v736_v51 = vadd.f32 %v2128_v38, %v735_v49  ;;  %v951_v49 = vld [vmem:[#allocation5 + $0x5a8] sm:$0xff] }
 0x2dd   : > { %v2130_v52 = vpop.eup %2129 }
 0x2de   : > { %v740_v54 = vsel %vm739_vm9, %v2128_v38, %v736_v51  ;;  %v748_v55 = vmul.f32 %v2130_v52, %v731_v43  ;;  %vm753_vm12 = vweird.f32 %v2130_v52  ;;  %v831_v38 = vld [vmem:[#allocation5 + $0x1e8] sm:$0xff]  ;;  %v942_v51 = vld [vmem:[#allocation5 + $0x560] sm:$0xff] }
 0x2df   : > { %v745_v56 = vsel %vm742_vm10, %v744_v53, %v740_v54  ;;  %vm2533_vm13 = vmor %vm752_vm11, %vm753_vm12  ;;  %v959_v43 = vld [vmem:[#allocation5 + $0x5e8] sm:$0xff]  ;;  %v806_v54 = vld [vmem:[#allocation5 + $0x120] sm:$0xff] }
 0x2e0   : > { %v762_v59 = vmul.f32 %v745_v56, %v2505_v47  ;;  %v763_v60 = vmul.f32 %v745_v56, %v2508_v48  ;;  %v749_v61 = vsub.f32 1.0, %v748_v55  ;;  %v895_v47 = vld [vmem:[#allocation5 + $0x3e8] sm:$0xff]  ;;  %v1014_v48 = vld [vmem:[#allocation5 + $0x7a0] sm:$0xff] }
 0x2e1   : > { %v943_v53 = vld [vmem:[#allocation5 + $0x568] sm:$0xff]  ;;  %v934_v55 = vld [vmem:[#allocation5 + $0x520] sm:$0xff] }
 0x2e2   : > { %v2528_v62 = vadd.f32 %v762_v59, %v2486_v28  ;;  %v2531_v63 = vadd.f32 %v763_v60, %v2488_v29  ;;  %v750_v0 = vmul.f32 %v2130_v52, %v749_v61  ;;  %v1023_v28 = vld [vmem:[#allocation5 + $0x7e8] sm:$0xff]  ;;  %v886_v29 = vld [vmem:[#allocation5 + $0x3a0] sm:$0xff] }
 0x2e3   : > { %v807_v56 = vld [vmem:[#allocation5 + $0x128] sm:$0xff]  ;;  %v926_v59 = vld [vmem:[#allocation5 + $0x4e0] sm:$0xff] }
 0x2e4   : > { %v751_v5 = vadd.f32 %v2130_v52, %v750_v0  ;;  %1042 = vmatmul.f32.vlgmr.msrb.gmra.mxu0 %v2528_v62  ;;  %1065 = vmatmul.f32.vlgmr.msrb.gmra.mxu1 %v2531_v63  ;;  %v799_v60 = vld [vmem:[#allocation5 + $0xe8] sm:$0xff]  ;;  %v790_v0 = vld [vmem:[#allocation5 + $0xa0] sm:$0xff] }
 0x2e5   : > { %1088 = vmatmul.f32.vlgmr.msra.gmra.mxu2 %v2528_v62  ;;  %1111 = vmatmul.f32.vlgmr.msra.gmra.mxu3 %v2531_v63  ;;  %v927_v61 = vld [vmem:[#allocation5 + $0x4e8] sm:$0xff] }
 0x2e6   : > { %v755_v6 = vsel %vm2533_vm13, %v2130_v52, %v751_v5  ;;  %1210 = vmatpush.msrb.mxu0 %v894_v3  ;;  %1233 = vmatpush.msrb.mxu1 %v1022_v4  ;;  %v815_v52 = vld [vmem:[#allocation5 + $0x168] sm:$0xff]  ;;  %v782_v4 = vld [vmem:[#allocation5 + $0x60] sm:$0xff] }
 0x2e7   : > { %v760_v9 = vsel %vm757_vm14, %v759_v2, %v755_v6  ;;  %1256 = vmatpush.msra.mxu2 %v895_v47  ;;  %1279 = vmatpush.msra.mxu3 %v1023_v28  ;;  %v791_v2 = vld [vmem:[#allocation5 + $0xa8] sm:$0xff]  ;;  %v910_v5 = vld [vmem:[#allocation5 + $0x460] sm:$0xff] }
 0x2e8   : > { %v764_v12 = vmul.f32 %v760_v9, %v2495_v41  ;;  %v765_v13 = vmul.f32 %v760_v9, %v2498_v42  ;;  %1211 = vmatpush.msrb.mxu0 %v886_v29  ;;  %1234 = vmatpush.msrb.mxu1 %v1014_v48  ;;  %v999_v41 = vld [vmem:[#allocation5 + $0x728] sm:$0xff]  ;;  %v862_v42 = vld [vmem:[#allocation5 + $0x2e0] sm:$0xff]  ;;  %v1024_v9 = vld [vmem:[#allocation5 + $0x7f0] sm:$0xff] }
 0x2e9   : > { %1257 = vmatpush.msra.mxu2 %v887_v7  ;;  %1280 = vmatpush.msra.mxu3 %v1015_v8  ;;  %v919_v3 = vld [vmem:[#allocation5 + $0x4a8] sm:$0xff]  ;;  %v774_v29 = vld [vmem:[#allocation5 + $0x20] sm:$0xff]  ;;  %v896_v8 = vld [vmem:[#allocation5 + $0x3f0] sm:$0xff] }
 0x2ea   : > { %v2546_v18 = vadd.f32 %v764_v12, %v2490_v39  ;;  %v2549_v19 = vadd.f32 %v765_v13, %v2492_v40  ;;  %1212 = vmatpush.msrb.mxu0 %v878_v10  ;;  %1235 = vmatpush.msrb.mxu1 %v1006_v11  ;;  %v863_v39 = vld [vmem:[#allocation5 + $0x2e8] sm:$0xff]  ;;  %v854_v40 = vld [vmem:[#allocation5 + $0x2a0] sm:$0xff]  ;;  %v897_v10 = vld [vmem:[#allocation5 + $0x3f8] sm:$0xff] }
 0x2eb   : > { %1258 = vmatpush.msra.mxu2 %v879_v14  ;;  %1281 = vmatpush.msra.mxu3 %v1007_v15  ;;  %v783_v47 = vld [vmem:[#allocation5 + $0x68] sm:$0xff]  ;;  %v902_v48 = vld [vmem:[#allocation5 + $0x420] sm:$0xff]  ;;  %v1025_v11 = vld [vmem:[#allocation5 + $0x7f8] sm:$0xff] }
 0x2ec   : > { %1213 = vmatpush.msrb.mxu0 %v870_v16  ;;  %1236 = vmatpush.msrb.mxu1 %v998_v17  ;;  %v911_v28 = vld [vmem:[#allocation5 + $0x468] sm:$0xff]  ;;  %v888_v12 = vld [vmem:[#allocation5 + $0x3b0] sm:$0xff]  ;;  %v889_v14 = vld [vmem:[#allocation5 + $0x3b8] sm:$0xff] }
 0x2ed   : > { %1259 = vmatpush.msra.mxu2 %v871_v20  ;;  %1282 = vmatpush.msra.mxu3 %v999_v41  ;;  %v775_v6 = vld [vmem:[#allocation5 + $0x28] sm:$0xff]  ;;  %v1016_v13 = vld [vmem:[#allocation5 + $0x7b0] sm:$0xff]  ;;  %v1017_v15 = vld [vmem:[#allocation5 + $0x7b8] sm:$0xff] }
 0x2ee   : > { %1045 = vmatmul.f32.gmra.mxu0 %v2546_v18  ;;  %1068 = vmatmul.f32.gmra.mxu1 %v2549_v19  ;;  %v903_v7 = vld [vmem:[#allocation5 + $0x428] sm:$0xff]  ;;  %v880_v16 = vld [vmem:[#allocation5 + $0x370] sm:$0xff]  ;;  %v881_v20 = vld [vmem:[#allocation5 + $0x378] sm:$0xff] }
 0x2ef   : > { %1091 = vmatmul.f32.gmra.mxu2 %v2546_v18  ;;  %1114 = vmatmul.f32.gmra.mxu3 %v2549_v19  ;;  %v1008_v17 = vld [vmem:[#allocation5 + $0x770] sm:$0xff]  ;;  %v1009_v41 = vld [vmem:[#allocation5 + $0x778] sm:$0xff] }
 0x2f0   : > { %1214 = vmatpush.msrb.mxu0 %v862_v42  ;;  %1237 = vmatpush.msrb.mxu1 %v990_v21  ;;  %v872_v42 = vld [vmem:[#allocation5 + $0x330] sm:$0xff] }
 0x2f1   : > { %1260 = vmatpush.msra.mxu2 %v863_v39  ;;  %1283 = vmatpush.msra.mxu3 %v991_v22  ;;  %v1000_v21 = vld [vmem:[#allocation5 + $0x730] sm:$0xff]  ;;  %v873_v39 = vld [vmem:[#allocation5 + $0x338] sm:$0xff] }
 0x2f2   : > { %1215 = vmatpush.msrb.mxu0 %v854_v40  ;;  %1238 = vmatpush.msrb.mxu1 %v982_v23  ;;  %v1001_v22 = vld [vmem:[#allocation5 + $0x738] sm:$0xff]  ;;  %v864_v40 = vld [vmem:[#allocation5 + $0x2f0] sm:$0xff] }
 0x2f3   : > { %1261 = vmatpush.msra.mxu2 %v855_v24  ;;  %1284 = vmatpush.msra.mxu3 %v983_v25  ;;  %v992_v23 = vld [vmem:[#allocation5 + $0x6f0] sm:$0xff]  ;;  %v865_v24 = vld [vmem:[#allocation5 + $0x2f8] sm:$0xff] }
 0x2f4   : > { %1216 = vmatpush.msrb.mxu0 %v846_v26  ;;  %1239 = vmatpush.msrb.mxu1 %v974_v27  ;;  %v993_v25 = vld [vmem:[#allocation5 + $0x6f8] sm:$0xff]  ;;  %v856_v26 = vld [vmem:[#allocation5 + $0x2b0] sm:$0xff] }
 0x2f5   : > { %1262 = vmatpush.msra.mxu2 %v847_v30  ;;  %1285 = vmatpush.msra.mxu3 %v975_v31  ;;  %v984_v27 = vld [vmem:[#allocation5 + $0x6b0] sm:$0xff]  ;;  %v857_v30 = vld [vmem:[#allocation5 + $0x2b8] sm:$0xff] }
 0x2f6   : > { %1217 = vmatpush.msrb.mxu0 %v838_v32  ;;  %1240 = vmatpush.msrb.mxu1 %v966_v33  ;;  %v985_v31 = vld [vmem:[#allocation5 + $0x6b8] sm:$0xff]  ;;  %v848_v32 = vld [vmem:[#allocation5 + $0x270] sm:$0xff] }
 0x2f7   : > { %1263 = vmatpush.msra.mxu2 %v839_v34  ;;  %1286 = vmatpush.msra.mxu3 %v967_v35  ;;  %v976_v33 = vld [vmem:[#allocation5 + $0x670] sm:$0xff]  ;;  %v849_v34 = vld [vmem:[#allocation5 + $0x278] sm:$0xff] }
 0x2f8   : > { %1134 = vmatmul.f32.vlgmr.msra.gmra.mxu0 %v2528_v62  ;;  %1157 = vmatmul.f32.vlgmr.msra.gmra.mxu1 %v2531_v63  ;;  %v977_v35 = vld [vmem:[#allocation5 + $0x678] sm:$0xff] }
 0x2f9   : > { %1180 = vmatmul.f32.vlgmr.msrb.gmra.mxu2 %v2528_v62  ;;  %1203 = vmatmul.f32.vlgmr.msrb.gmra.mxu3 %v2531_v63 }
 0x2fa   : > { %1218 = vmatpush.msrb.mxu0 %v830_v36  ;;  %1241 = vmatpush.msrb.mxu1 %v958_v37  ;;  %v840_v36 = vld [vmem:[#allocation5 + $0x230] sm:$0xff] }
 0x2fb   : > { %1264 = vmatpush.msra.mxu2 %v831_v38  ;;  %1287 = vmatpush.msra.mxu3 %v959_v43  ;;  %v968_v37 = vld [vmem:[#allocation5 + $0x630] sm:$0xff]  ;;  %v841_v38 = vld [vmem:[#allocation5 + $0x238] sm:$0xff] }
 0x2fc   : > { %1219 = vmatpush.msrb.mxu0 %v822_v44  ;;  %1242 = vmatpush.msrb.mxu1 %v950_v45  ;;  %v969_v43 = vld [vmem:[#allocation5 + $0x638] sm:$0xff]  ;;  %v832_v44 = vld [vmem:[#allocation5 + $0x1f0] sm:$0xff] }
 0x2fd   : > { %1265 = vmatpush.msra.mxu2 %v823_v46  ;;  %1288 = vmatpush.msra.mxu3 %v951_v49  ;;  %v960_v45 = vld [vmem:[#allocation5 + $0x5f0] sm:$0xff]  ;;  %v833_v46 = vld [vmem:[#allocation5 + $0x1f8] sm:$0xff] }
 0x2fe   : > { %1220 = vmatpush.msrb.mxu0 %v814_v50  ;;  %1243 = vmatpush.msrb.mxu1 %v942_v51  ;;  %v961_v49 = vld [vmem:[#allocation5 + $0x5f8] sm:$0xff]  ;;  %v824_v50 = vld [vmem:[#allocation5 + $0x1b0] sm:$0xff] }
 0x2ff   : > { %1266 = vmatpush.msra.mxu2 %v815_v52  ;;  %1289 = vmatpush.msra.mxu3 %v943_v53  ;;  %v952_v51 = vld [vmem:[#allocation5 + $0x5b0] sm:$0xff]  ;;  %v825_v52 = vld [vmem:[#allocation5 + $0x1b8] sm:$0xff] }
 0x300   : > { %1221 = vmatpush.msrb.mxu0 %v806_v54  ;;  %1244 = vmatpush.msrb.mxu1 %v934_v55  ;;  %v953_v53 = vld [vmem:[#allocation5 + $0x5b8] sm:$0xff]  ;;  %v816_v54 = vld [vmem:[#allocation5 + $0x170] sm:$0xff] }
 0x301   : > { %1267 = vmatpush.msra.mxu2 %v807_v56  ;;  %1290 = vmatpush.msra.mxu3 %v935_v57  ;;  %v944_v55 = vld [vmem:[#allocation5 + $0x570] sm:$0xff]  ;;  %v817_v56 = vld [vmem:[#allocation5 + $0x178] sm:$0xff] }
 0x302   : > { %1137 = vmatmul.f32.gmra.mxu0 %v2546_v18  ;;  %1160 = vmatmul.f32.gmra.mxu1 %v2549_v19  ;;  %v945_v57 = vld [vmem:[#allocation5 + $0x578] sm:$0xff] }
 0x303   : > { %1183 = vmatmul.f32.gmra.mxu2 %v2546_v18  ;;  %1206 = vmatmul.f32.gmra.mxu3 %v2549_v19 }
 0x304   : > { %1222 = vmatpush.msrb.mxu0 %v798_v58  ;;  %1245 = vmatpush.msrb.mxu1 %v926_v59  ;;  %v808_v58 = vld [vmem:[#allocation5 + $0x130] sm:$0xff] }
 0x305   : > { %1268 = vmatpush.msra.mxu2 %v799_v60  ;;  %1291 = vmatpush.msra.mxu3 %v927_v61  ;;  %v936_v59 = vld [vmem:[#allocation5 + $0x530] sm:$0xff]  ;;  %v809_v60 = vld [vmem:[#allocation5 + $0x138] sm:$0xff] }
 0x306   : > { %1223 = vmatpush.msrb.mxu0 %v790_v0  ;;  %1246 = vmatpush.msrb.mxu1 %v918_v1  ;;  %v937_v61 = vld [vmem:[#allocation5 + $0x538] sm:$0xff]  ;;  %v800_v0 = vld [vmem:[#allocation5 + $0xf0] sm:$0xff] }
 0x307   : > { %1269 = vmatpush.msra.mxu2 %v791_v2  ;;  %1292 = vmatpush.msra.mxu3 %v919_v3  ;;  %v928_v1 = vld [vmem:[#allocation5 + $0x4f0] sm:$0xff]  ;;  %v801_v2 = vld [vmem:[#allocation5 + $0xf8] sm:$0xff] }
 0x308   : > { %1224 = vmatpush.msrb.mxu0 %v782_v4  ;;  %1247 = vmatpush.msrb.mxu1 %v910_v5  ;;  %v929_v3 = vld [vmem:[#allocation5 + $0x4f8] sm:$0xff]  ;;  %v792_v4 = vld [vmem:[#allocation5 + $0xb0] sm:$0xff] }
 0x309   : > { %1270 = vmatpush.msra.mxu2 %v783_v47  ;;  %1293 = vmatpush.msra.mxu3 %v911_v28  ;;  %v920_v5 = vld [vmem:[#allocation5 + $0x4b0] sm:$0xff]  ;;  %v793_v47 = vld [vmem:[#allocation5 + $0xb8] sm:$0xff] }
 0x30a   : > { %1225 = vmatpush.msrb.mxu0 %v774_v29  ;;  %1248 = vmatpush.msrb.mxu1 %v902_v48  ;;  %v921_v28 = vld [vmem:[#allocation5 + $0x4b8] sm:$0xff]  ;;  %v784_v29 = vld [vmem:[#allocation5 + $0x70] sm:$0xff] }
 0x30b   : > { %1271 = vmatpush.msra.mxu2 %v775_v6  ;;  %1294 = vmatpush.msra.mxu3 %v903_v7  ;;  %v912_v48 = vld [vmem:[#allocation5 + $0x470] sm:$0xff]  ;;  %v785_v6 = vld [vmem:[#allocation5 + $0x78] sm:$0xff] }
 0x30c   : > { %1302 = vmatpush.msra.mxu0 %v896_v8  ;;  %1325 = vmatpush.msra.mxu1 %v1024_v9  ;;  %v913_v7 = vld [vmem:[#allocation5 + $0x478] sm:$0xff]  ;;  %v776_v8 = vld [vmem:[#allocation5 + $0x30] sm:$0xff] }
 0x30d   : > { %1348 = vmatpush.msrb.mxu2 %v897_v10  ;;  %1371 = vmatpush.msrb.mxu3 %v1025_v11  ;;  %v904_v9 = vld [vmem:[#allocation5 + $0x430] sm:$0xff]  ;;  %v777_v10 = vld [vmem:[#allocation5 + $0x38] sm:$0xff] }
 0x30e   : > { %1226 = vmatmul.f32.vlgmr.msrb.gmra.mxu0 %v2528_v62  ;;  %1249 = vmatmul.f32.vlgmr.msrb.gmra.mxu1 %v2531_v63  ;;  %v905_v11 = vld [vmem:[#allocation5 + $0x438] sm:$0xff] }
 0x30f   : > { %1272 = vmatmul.f32.vlgmr.msra.gmra.mxu2 %v2528_v62  ;;  %1295 = vmatmul.f32.vlgmr.msra.gmra.mxu3 %v2531_v63 }
 0x310   : > { %1303 = vmatpush.msra.mxu0 %v888_v12  ;;  %1326 = vmatpush.msra.mxu1 %v1016_v13 }
 0x311   : > { %1349 = vmatpush.msrb.mxu2 %v889_v14  ;;  %1372 = vmatpush.msrb.mxu3 %v1017_v15 }
 0x312   : > { %1304 = vmatpush.msra.mxu0 %v880_v16  ;;  %1327 = vmatpush.msra.mxu1 %v1008_v17 }
 0x313   : > { %1350 = vmatpush.msrb.mxu2 %v881_v20  ;;  %1373 = vmatpush.msrb.mxu3 %v1009_v41 }
 0x314   : > { %1305 = vmatpush.msra.mxu0 %v872_v42  ;;  %1328 = vmatpush.msra.mxu1 %v1000_v21 }
 0x315   : > { %1351 = vmatpush.msrb.mxu2 %v873_v39  ;;  %1374 = vmatpush.msrb.mxu3 %v1001_v22 }
 0x316   : > { %1306 = vmatpush.msra.mxu0 %v864_v40  ;;  %1329 = vmatpush.msra.mxu1 %v992_v23  ;;  %v2592_v40 = vld [vmem:[%s2758_s8 + $0x8] sm:$0xff] }
 0x317   : > { %1352 = vmatpush.msrb.mxu2 %v865_v24  ;;  %1375 = vmatpush.msrb.mxu3 %v993_v25 }
 0x318   : > { %1229 = vmatmul.f32.gmra.mxu0 %v2546_v18  ;;  %1252 = vmatmul.f32.gmra.mxu1 %v2549_v19 }
 0x319   : > { %1275 = vmatmul.f32.gmra.mxu2 %v2546_v18  ;;  %1298 = vmatmul.f32.gmra.mxu3 %v2549_v19 }
 0x31a   : > { %1307 = vmatpush.msra.mxu0 %v856_v26  ;;  %1330 = vmatpush.msra.mxu1 %v984_v27 }
 0x31b   : > { %1353 = vmatpush.msrb.mxu2 %v857_v30  ;;  %1376 = vmatpush.msrb.mxu3 %v985_v31  ;;  %v1397_v31 = vld [vmem:[%s2759_s9 + $0x8] sm:$0xff] }
 0x31c   : > { %1308 = vmatpush.msra.mxu0 %v848_v32  ;;  %1331 = vmatpush.msra.mxu1 %v976_v33 }
 0x31d   : > { %1354 = vmatpush.msrb.mxu2 %v849_v34  ;;  %1377 = vmatpush.msrb.mxu3 %v977_v35 }
 0x31e   : > { %1309 = vmatpush.msra.mxu0 %v840_v36  ;;  %1332 = vmatpush.msra.mxu1 %v968_v37 }
 0x31f   : > { %1355 = vmatpush.msrb.mxu2 %v841_v38  ;;  %1378 = vmatpush.msrb.mxu3 %v969_v43 }
 0x320   : > { %1310 = vmatpush.msra.mxu0 %v832_v44  ;;  %1333 = vmatpush.msra.mxu1 %v960_v45 }
 0x321   : > { %1356 = vmatpush.msrb.mxu2 %v833_v46  ;;  %1379 = vmatpush.msrb.mxu3 %v961_v49 }
 0x322   : > { %1311 = vmatpush.msra.mxu0 %v824_v50  ;;  %1334 = vmatpush.msra.mxu1 %v952_v51 }
 0x323   : > { %1357 = vmatpush.msrb.mxu2 %v825_v52  ;;  %1380 = vmatpush.msrb.mxu3 %v953_v53 }
 0x324   : > { %1312 = vmatpush.msra.mxu0 %v816_v54  ;;  %1335 = vmatpush.msra.mxu1 %v944_v55  ;;  %v1616_v54 = vld [vmem:[%s2761_s11] sm:$0xff] }
 0x325   : > { %1358 = vmatpush.msrb.mxu2 %v817_v56  ;;  %1381 = vmatpush.msrb.mxu3 %v945_v57  ;;  %v1617_v57 = vld [vmem:[%s2761_s11 + $0x8] sm:$0xff] }
 0x326   : > { %1313 = vmatpush.msra.mxu0 %v808_v58  ;;  %1336 = vmatpush.msra.mxu1 %v936_v59 }
 0x327   : > { %1359 = vmatpush.msrb.mxu2 %v809_v60  ;;  %1382 = vmatpush.msrb.mxu3 %v937_v61 }
 0x328   : > { %1314 = vmatpush.msra.mxu0 %v800_v0  ;;  %1337 = vmatpush.msra.mxu1 %v928_v1 }
 0x329   : > { %1360 = vmatpush.msrb.mxu2 %v801_v2  ;;  %1383 = vmatpush.msrb.mxu3 %v929_v3 }
 0x32a   : > { %1315 = vmatpush.msra.mxu0 %v792_v4  ;;  %1338 = vmatpush.msra.mxu1 %v920_v5 }
 0x32b   : > { %1361 = vmatpush.msrb.mxu2 %v793_v47  ;;  %1384 = vmatpush.msrb.mxu3 %v921_v28 }
 0x32c   : > { %1316 = vmatpush.msra.mxu0 %v784_v29  ;;  %1339 = vmatpush.msra.mxu1 %v912_v48 }
 0x32d   : > { %1362 = vmatpush.msrb.mxu2 %v785_v6  ;;  %1385 = vmatpush.msrb.mxu3 %v913_v7 }
 0x32e   : > { %1317 = vmatpush.msra.mxu0 %v776_v8  ;;  %1340 = vmatpush.msra.mxu1 %v904_v9 }
 0x32f   : > { %1363 = vmatpush.msrb.mxu2 %v777_v10  ;;  %1386 = vmatpush.msrb.mxu3 %v905_v11  ;;  %v2642_v11 = vld [vmem:[%s2760_s10] sm:$0xff] }
 0x330   : > { %1318 = vmatmul.f32.vlgmr.msra.gmra.mxu0 %v2528_v62  ;;  %1341 = vmatmul.f32.vlgmr.msra.gmra.mxu1 %v2531_v63 }
 0x331   : > { %1364 = vmatmul.f32.vlgmr.msrb.gmra.mxu2 %v2528_v62  ;;  %1387 = vmatmul.f32.vlgmr.msrb.gmra.mxu3 %v2531_v63  ;;  %v1396_v62 = vld [vmem:[%s2759_s9] sm:$0xff] }
 0x332   : > { %1400 = vperm.xlu1 %2120, %v1396_v62   ;;  %1405 = vperm.xlu2 %2119, %v1397_v31  }
 0x338   : > { %1321 = vmatmul.f32.gmra.mxu0 %v2546_v18  ;;  %1344 = vmatmul.f32.gmra.mxu1 %v2549_v19 }
 0x339   : > { %1367 = vmatmul.f32.gmra.mxu2 %v2546_v18  ;;  %1390 = vmatmul.f32.gmra.mxu3 %v2549_v19  ;;  %v2585_v18 = vld [vmem:[%s2758_s8] sm:$0xff] }
 0x33a   : > { %1620 = vperm.xlu2 %2119, %v1616_v54  }
 0x342   : > { %1625 = vperm.xlu2 %2119, %v1617_v57  }
 0x361   : > { %v1043_v12 = vpop.f32.mrf.mxu0  ;;  %v1066_v13 = vpop.f32.mrf.mxu1 }
 0x362   : > { %v1067_v63 = vadd.f32 %v1066_v13, %v1043_v12 }
 0x368   : > { %v1089_v14 = vpop.f32.mrf.mxu2  ;;  %v1112_v15 = vpop.f32.mrf.mxu3 }
 0x369   : > { %v1113_v21 = vadd.f32 %v1112_v15, %v1089_v14 }
 0x36b   : > { %v1046_v16 = vpop.f32.mrf.mxu0  ;;  %v1069_v17 = vpop.f32.mrf.mxu1 }
 0x36c   : > { %v1070_v20 = vadd.f32 %v1069_v17, %v1046_v16  ;;  %v2651_v17 = vld [vmem:[%s2760_s10 + $0x8] sm:$0xff] }
 0x36e   : > { %1428 = vmatpush.msrb.mxu0 %v1070_v20 }
 0x370   : > { %1429 = vmatpush.msrb.mxu0 %v1067_v63 }
 0x371   : > { %2000 = vmatmul.msk.f32.vlgmr.msrb.gmra.mxu0 %vm657_vm4, %v2585_v18 }
 0x372   : > { %v1092_v19 = vpop.f32.mrf.mxu2  ;;  %v1115_v41 = vpop.f32.mrf.mxu3 }
 0x373   : > { %v1116_v42 = vadd.f32 %v1115_v41, %v1092_v19 }
 0x375   : > { %v1135_v39 = vpop.f32.mrf.mxu0  ;;  %v1158_v22 = vpop.f32.mrf.mxu1  ;;  %1451 = vmatpush.msrb.mxu1 %v1116_v42 }
 0x376   : > { %v1159_v30 = vadd.f32 %v1158_v22, %v1135_v39 }
 0x377   : > { %1452 = vmatpush.msrb.mxu1 %v1113_v21 }
 0x378   : > { %2002 = vmatmul.msk.f32.vlgmr.msrb.gmra.mxu1 %vm657_vm4, %v2585_v18 }
 0x379   : > { %2001 = vmatmul.msk.f32.gmra.mxu0 %vm657_vm4, %v2592_v40 }
 0x37c   : > { %v1181_v23 = vpop.f32.mrf.mxu2  ;;  %v1204_v24 = vpop.f32.mrf.mxu3 }
 0x37d   : > { %v1205_v35 = vadd.f32 %v1204_v24, %v1181_v23 }
 0x37f   : > { %v1138_v25 = vpop.f32.mrf.mxu0  ;;  %v1161_v26 = vpop.f32.mrf.mxu1 }
 0x380   : > { %v1162_v27 = vadd.f32 %v1161_v26, %v1138_v25  ;;  %2003 = vmatmul.msk.f32.gmra.mxu1 %vm657_vm4, %v2592_v40 }
 0x382   : > { %1474 = vmatpush.msra.mxu2 %v1162_v27 }
 0x384   : > { %1475 = vmatpush.msra.mxu2 %v1159_v30 }
 0x385   : > { %2004 = vmatmul.msk.f32.vlgmr.msra.gmra.mxu2 %vm657_vm4, %v2585_v18 }
 0x386   : > { %v1184_v32 = vpop.f32.mrf.mxu2  ;;  %v1207_v33 = vpop.f32.mrf.mxu3 }
 0x387   : > { %v1208_v34 = vadd.f32 %v1207_v33, %v1184_v32 }
 0x389   : > { %1497 = vmatpush.msra.mxu3 %v1208_v34 }
 0x38b   : > { %v1227_v36 = vpop.f32.mrf.mxu0  ;;  %v1250_v37 = vpop.f32.mrf.mxu1  ;;  %1498 = vmatpush.msra.mxu3 %v1205_v35 }
 0x38c   : > { %2006 = vmatmul.msk.f32.vlgmr.msra.gmra.mxu3 %vm657_vm4, %v2585_v18  ;;  %v1251_v49 = vadd.f32 %v1250_v37, %v1227_v36  ;;  %v2635_v29 = vpop.permute.xlu2 %1405 }
 0x38d   : > { %2005 = vmatmul.msk.f32.gmra.mxu2 %vm657_vm4, %v2592_v40 }
 0x392   : > { %v1273_v38 = vpop.f32.mrf.mxu2  ;;  %v1296_v43 = vpop.f32.mrf.mxu3 }
 0x393   : > { %v1297_v53 = vadd.f32 %v1296_v43, %v1273_v38 }
 0x394   : > { %2007 = vmatmul.msk.f32.gmra.mxu3 %vm657_vm4, %v2592_v40 }
 0x395   : > { %v1230_v44 = vpop.f32.mrf.mxu0  ;;  %v1253_v45 = vpop.f32.mrf.mxu1 }
 0x396   : > { %v1254_v46 = vadd.f32 %v1253_v45, %v1230_v44 }
 0x398   : > { %1520 = vmatpush.msra.mxu0 %v1254_v46 }
 0x39a   : > { %1521 = vmatpush.msra.mxu0 %v1251_v49 }
 0x39b   : > { %2008 = vmatmul.msk.f32.vlgmr.msra.gmra.mxu0 %vm657_vm4, %v2585_v18 }
 0x39c   : > { %v1276_v50 = vpop.f32.mrf.mxu2  ;;  %v1299_v51 = vpop.f32.mrf.mxu3 }
 0x39d   : > { %v1300_v52 = vadd.f32 %v1299_v51, %v1276_v50 }
 0x39f   : > { %1543 = vmatpush.msra.mxu1 %v1300_v52 }
 0x3a1   : > { %1544 = vmatpush.msra.mxu1 %v1297_v53 }
 0x3a2   : > { %2010 = vmatmul.msk.f32.vlgmr.msra.gmra.mxu1 %vm657_vm4, %v2585_v18 }
 0x3a3   : > { %2009 = vmatmul.msk.f32.gmra.mxu0 %vm657_vm4, %v2592_v40 }
 0x3a4   : > { %v2633_v28 = vpop.permute.xlu1 %1400 }
 0x3aa   : > { %2011 = vmatmul.msk.f32.gmra.mxu1 %vm657_vm4, %v2592_v40 }
 0x3ad   : > { %v1319_v55 = vpop.f32.mrf.mxu0  ;;  %v1342_v56 = vpop.f32.mrf.mxu1 }
 0x3ae   : > { %v1343_v1 = vadd.f32 %v1342_v56, %v1319_v55  ;;  %v1621_v56 = vpop.permute.xlu2 %1620 }
 0x3b4   : > { %v1365_v58 = vpop.f32.mrf.mxu2  ;;  %v1388_v59 = vpop.f32.mrf.mxu3 }
 0x3b5   : > { %v1322_v60 = vpop.f32.mrf.mxu0  ;;  %v1345_v61 = vpop.f32.mrf.mxu1  ;;  %v1389_v5 = vadd.f32 %v1388_v59, %v1365_v58 }
 0x3b6   : > { %v1346_v0 = vadd.f32 %v1345_v61, %v1322_v60  ;;  %v1626_v61 = vpop.permute.xlu2 %1625 }
 0x3b8   : > { %1566 = vmatpush.msrb.mxu2 %v1346_v0 }
 0x3ba   : > { %1567 = vmatpush.msrb.mxu2 %v1343_v1 }
 0x3bb   : > { %2012 = vmatmul.msk.f32.vlgmr.msrb.gmra.mxu2 %vm657_vm4, %v2585_v18 }
 0x3bc   : > { %v1368_v2 = vpop.f32.mrf.mxu2  ;;  %v1391_v3 = vpop.f32.mrf.mxu3 }
 0x3bd   : > { %v1392_v4 = vadd.f32 %v1391_v3, %v1368_v2 }
 0x3bf   : > { %1589 = vmatpush.msrb.mxu3 %v1392_v4 }
 0x3c1   : > { %1590 = vmatpush.msrb.mxu3 %v1389_v5 }
 0x3c2   : > { %2014 = vmatmul.msk.f32.vlgmr.msrb.gmra.mxu3 %vm657_vm4, %v2585_v18 }
 0x3c3   : > { %2013 = vmatmul.msk.f32.gmra.mxu2 %vm657_vm4, %v2592_v40 }
 0x3ca   : > { %2015 = vmatmul.msk.f32.gmra.mxu3 %vm657_vm4, %v2592_v40 }
 0x3ee   : > { %v1431_v47 = vpop.f32.mrf.mxu0 }
 0x3ef   : > { %v1432_v6 = vadd.f32 %v1431_v47, %v2633_v28 }
 0x3f1   : > { %v1598_v10 = vmax.f32 %v1432_v6, 0.0 }
 0x3f5   : > { %v1454_v48 = vpop.f32.mrf.mxu1 }
 0x3f6   : > { %v1434_v7 = vpop.f32.mrf.mxu0  ;;  %v1455_v12 = vadd.f32 %v1454_v48, %v2633_v28 }
 0x3f7   : > { %v1435_v8 = vadd.f32 %v1434_v7, %v2635_v29 }
 0x3f8   : > { %v1599_v16 = vmax.f32 %v1455_v12, 0.0 }
 0x3f9   : > { %v1606_v9 = vmax.f32 %v1435_v8, 0.0 }
 0x3fb   : > { %1648 = vmatpush.msrb.mxu0 %v1606_v9 }
 0x3fd   : > { %v1457_v13 = vpop.f32.mrf.mxu1  ;;  %1649 = vmatpush.msrb.mxu0 %v1598_v10 }
 0x3fe   : > { %v1458_v14 = vadd.f32 %v1457_v13, %v2635_v29  ;;  %2016 = vmatmul.msk.f32.vlgmr.msrb.gmra.mxu0 %vm657_vm4, %v2642_v11 }
 0x400   : > { %v1607_v15 = vmax.f32 %v1458_v14, 0.0 }
 0x402   : > { %1671 = vmatpush.msrb.mxu1 %v1607_v15 }
 0x404   : > { %1672 = vmatpush.msrb.mxu1 %v1599_v16 }
 0x405   : > { %2018 = vmatmul.msk.f32.vlgmr.msrb.gmra.mxu1 %vm657_vm4, %v2642_v11 }
 0x406   : > { %2017 = vmatmul.msk.f32.gmra.mxu0 %vm657_vm4, %v2651_v17 }
 0x408   : > { %v1477_v20 = vpop.f32.mrf.mxu2 }
 0x409   : > { %v1478_v62 = vadd.f32 %v1477_v20, %v2633_v28 }
 0x40b   : > { %v1600_v41 = vmax.f32 %v1478_v62, 0.0 }
 0x40d   : > { %2019 = vmatmul.msk.f32.gmra.mxu1 %vm657_vm4, %v2651_v17 }
 0x40f   : > { %v1500_v63 = vpop.f32.mrf.mxu3 }
 0x410   : > { %v1480_v18 = vpop.f32.mrf.mxu2  ;;  %v1501_v21 = vadd.f32 %v1500_v63, %v2633_v28 }
 0x411   : > { %v1481_v19 = vadd.f32 %v1480_v18, %v2635_v29 }
 0x412   : > { %v1601_v23 = vmax.f32 %v1501_v21, 0.0 }
 0x413   : > { %v1608_v42 = vmax.f32 %v1481_v19, 0.0 }
 0x415   : > { %1694 = vmatpush.msra.mxu2 %v1608_v42 }
 0x417   : > { %v1503_v39 = vpop.f32.mrf.mxu3  ;;  %1695 = vmatpush.msra.mxu2 %v1600_v41 }
 0x418   : > { %v1523_v22 = vpop.f32.mrf.mxu0  ;;  %v1504_v40 = vadd.f32 %v1503_v39, %v2635_v29  ;;  %2020 = vmatmul.msk.f32.vlgmr.msra.gmra.mxu2 %vm657_vm4, %v2642_v11 }
 0x419   : > { %v1524_v25 = vadd.f32 %v1523_v22, %v2633_v28 }
 0x41a   : > { %v1609_v24 = vmax.f32 %v1504_v40, 0.0 }
 0x41b   : > { %v1602_v31 = vmax.f32 %v1524_v25, 0.0 }
 0x41c   : > { %1717 = vmatpush.msra.mxu3 %v1609_v24 }
 0x41e   : > { %1718 = vmatpush.msra.mxu3 %v1601_v23 }
 0x41f   : > { %v1546_v26 = vpop.f32.mrf.mxu1  ;;  %2022 = vmatmul.msk.f32.vlgmr.msra.gmra.mxu3 %vm657_vm4, %v2642_v11 }
 0x420   : > { %v1526_v27 = vpop.f32.mrf.mxu0  ;;  %2021 = vmatmul.msk.f32.gmra.mxu2 %vm657_vm4, %v2651_v17  ;;  %v1547_v33 = vadd.f32 %v1546_v26, %v2633_v28 }
 0x421   : > { %v1527_v30 = vadd.f32 %v1526_v27, %v2635_v29 }
 0x422   : > { %v1603_v36 = vmax.f32 %v1547_v33, 0.0 }
 0x423   : > { %v1610_v32 = vmax.f32 %v1527_v30, 0.0 }
 0x425   : > { %1740 = vmatpush.msra.mxu0 %v1610_v32 }
 0x427   : > { %v1549_v34 = vpop.f32.mrf.mxu1  ;;  %1741 = vmatpush.msra.mxu0 %v1602_v31  ;;  %2023 = vmatmul.msk.f32.gmra.mxu3 %vm657_vm4, %v2651_v17 }
 0x428   : > { %v1550_v35 = vadd.f32 %v1549_v34, %v2635_v29  ;;  %2024 = vmatmul.msk.f32.vlgmr.msra.gmra.mxu0 %vm657_vm4, %v2642_v11 }
 0x42a   : > { %v1611_v37 = vmax.f32 %v1550_v35, 0.0 }
 0x42c   : > { %1763 = vmatpush.msra.mxu1 %v1611_v37 }
 0x42e   : > { %1764 = vmatpush.msra.mxu1 %v1603_v36 }
 0x42f   : > { %2026 = vmatmul.msk.f32.vlgmr.msra.gmra.mxu1 %vm657_vm4, %v2642_v11 }
 0x430   : > { %2025 = vmatmul.msk.f32.gmra.mxu0 %vm657_vm4, %v2651_v17 }
 0x437   : > { %2027 = vmatmul.msk.f32.gmra.mxu1 %vm657_vm4, %v2651_v17 }
 0x43e   : > { %v1569_v38 = vpop.f32.mrf.mxu2 }
 0x43f   : > { %v1570_v45 = vadd.f32 %v1569_v38, %v2633_v28 }
 0x441   : > { %v1604_v50 = vmax.f32 %v1570_v45, 0.0 }
 0x445   : > { %v1592_v43 = vpop.f32.mrf.mxu3 }
 0x446   : > { %v1572_v44 = vpop.f32.mrf.mxu2  ;;  %v1593_v52 = vadd.f32 %v1592_v43, %v2633_v28 }
 0x447   : > { %v1573_v46 = vadd.f32 %v1572_v44, %v2635_v29 }
 0x448   : > { %v1605_v55 = vmax.f32 %v1593_v52, 0.0 }
 0x449   : > { %v1612_v49 = vmax.f32 %v1573_v46, 0.0 }
 0x44b   : > { %1786 = vmatpush.msrb.mxu2 %v1612_v49 }
 0x44d   : > { %v1595_v51 = vpop.f32.mrf.mxu3  ;;  %1787 = vmatpush.msrb.mxu2 %v1604_v50 }
 0x44e   : > { %v1596_v53 = vadd.f32 %v1595_v51, %v2635_v29  ;;  %2028 = vmatmul.msk.f32.vlgmr.msrb.gmra.mxu2 %vm657_vm4, %v2642_v11 }
 0x450   : > { %v1613_v54 = vmax.f32 %v1596_v53, 0.0 }
 0x452   : > { %1809 = vmatpush.msrb.mxu3 %v1613_v54 }
 0x454   : > { %1810 = vmatpush.msrb.mxu3 %v1605_v55 }
 0x455   : > { %2030 = vmatmul.msk.f32.vlgmr.msrb.gmra.mxu3 %vm657_vm4, %v2642_v11 }
 0x456   : > { %2029 = vmatmul.msk.f32.gmra.mxu2 %vm657_vm4, %v2651_v17 }
 0x45d   : > { %2031 = vmatmul.msk.f32.gmra.mxu3 %vm657_vm4, %v2651_v17 }
 0x47b   : > { %v1651_v57 = vpop.f32.mrf.mxu0 }
 0x47c   : > { %v1652_v58 = vadd.f32 %v1651_v57, %v1621_v56 }
 0x47e   : > { %v1818_v59 = vmax.f32 %v1652_v58, 0.0 }
 0x480   : > { %1834 = vst [vmem:[%s2698_s14] sm:$0xff] %v1818_v59 }
 0x482   : > { %v1674_v60 = vpop.f32.mrf.mxu1 }
 0x483   : > { %v1675_v0 = vadd.f32 %v1674_v60, %v1621_v56  ;;  %v1654_v1 = vpop.f32.mrf.mxu0 }
 0x484   : > { %v1655_v2 = vadd.f32 %v1654_v1, %v1626_v61 }
 0x485   : > { %v1819_v3 = vmax.f32 %v1675_v0, 0.0 }
 0x486   : > { %v1826_v4 = vmax.f32 %v1655_v2, 0.0 }
 0x487   : > { %1835 = vst [vmem:[%s2698_s14 + $0x8] sm:$0xff] %v1819_v3 }
 0x488   : > { %1842 = vst [vmem:[%s2698_s14 + $0x40] sm:$0xff] %v1826_v4 }
 0x48a   : > { %v1677_v5 = vpop.f32.mrf.mxu1 }
 0x48b   : > { %v1678_v47 = vadd.f32 %v1677_v5, %v1626_v61 }
 0x48d   : > { %v1827_v28 = vmax.f32 %v1678_v47, 0.0 }
 0x48f   : > { %1843 = vst [vmem:[%s2698_s14 + $0x48] sm:$0xff] %v1827_v28 }
 0x49b   : > { %v1697_v29 = vpop.f32.mrf.mxu2 }
 0x49c   : > { %v1698_v48 = vadd.f32 %v1697_v29, %v1621_v56 }
 0x49e   : > { %v1820_v6 = vmax.f32 %v1698_v48, 0.0 }
 0x4a0   : > { %1836 = vst [vmem:[%s2698_s14 + $0x10] sm:$0xff] %v1820_v6 }
 0x4a2   : > { %v1720_v7 = vpop.f32.mrf.mxu3 }
 0x4a3   : > { %v1721_v8 = vadd.f32 %v1720_v7, %v1621_v56  ;;  %v1700_v9 = vpop.f32.mrf.mxu2 }
 0x4a4   : > { %v1701_v10 = vadd.f32 %v1700_v9, %v1626_v61 }
 0x4a5   : > { %v1743_v11 = vpop.f32.mrf.mxu0  ;;  %v1821_v12 = vmax.f32 %v1721_v8, 0.0 }
 0x4a6   : > { %v1744_v13 = vadd.f32 %v1743_v11, %v1621_v56  ;;  %v1828_v14 = vmax.f32 %v1701_v10, 0.0 }
 0x4a7   : > { %1837 = vst [vmem:[%s2698_s14 + $0x18] sm:$0xff] %v1821_v12 }
 0x4a8   : > { %v1822_v15 = vmax.f32 %v1744_v13, 0.0  ;;  %1844 = vst [vmem:[%s2698_s14 + $0x50] sm:$0xff] %v1828_v14 }
 0x4aa   : > { %1838 = vst [vmem:[%s2698_s14 + $0x20] sm:$0xff] %v1822_v15  ;;  %v1723_v16 = vpop.f32.mrf.mxu3 }
 0x4ab   : > { %v1724_v17 = vadd.f32 %v1723_v16, %v1626_v61 }
 0x4ac   : > { %v1766_v20 = vpop.f32.mrf.mxu1 }
 0x4ad   : > { %v1767_v62 = vadd.f32 %v1766_v20, %v1621_v56  ;;  %v1746_v63 = vpop.f32.mrf.mxu0  ;;  %v1829_v18 = vmax.f32 %v1724_v17, 0.0 }
 0x4ae   : > { %v1747_v19 = vadd.f32 %v1746_v63, %v1626_v61 }
 0x4af   : > { %v1823_v41 = vmax.f32 %v1767_v62, 0.0  ;;  %1845 = vst [vmem:[%s2698_s14 + $0x58] sm:$0xff] %v1829_v18 }
 0x4b0   : > { %v1830_v42 = vmax.f32 %v1747_v19, 0.0 }
 0x4b1   : > { %1839 = vst [vmem:[%s2698_s14 + $0x28] sm:$0xff] %v1823_v41 }
 0x4b2   : > { %1846 = vst [vmem:[%s2698_s14 + $0x60] sm:$0xff] %v1830_v42 }
 0x4b4   : > { %v1769_v21 = vpop.f32.mrf.mxu1 }
 0x4b5   : > { %v1770_v39 = vadd.f32 %v1769_v21, %v1626_v61 }
 0x4b7   : > { %v1831_v22 = vmax.f32 %v1770_v39, 0.0 }
 0x4b9   : > { %1847 = vst [vmem:[%s2698_s14 + $0x68] sm:$0xff] %v1831_v22 }
 0x4d1   : > { %v1789_v40 = vpop.f32.mrf.mxu2 }
 0x4d2   : > { %v1790_v23 = vadd.f32 %v1789_v40, %v1621_v56 }
 0x4d4   : > { %v1824_v24 = vmax.f32 %v1790_v23, 0.0 }
 0x4d6   : > { %1840 = vst [vmem:[%s2698_s14 + $0x30] sm:$0xff] %v1824_v24 }
 0x4d8   : > { %v1812_v25 = vpop.f32.mrf.mxu3 }
 0x4d9   : > { %v1813_v26 = vadd.f32 %v1812_v25, %v1621_v56  ;;  %v1792_v27 = vpop.f32.mrf.mxu2 }
 0x4da   : > { %v1793_v30 = vadd.f32 %v1792_v27, %v1626_v61 }
 0x4db   : > { %v1825_v31 = vmax.f32 %v1813_v26, 0.0 }
 0x4dc   : > { %v1832_v32 = vmax.f32 %v1793_v30, 0.0 }
 0x4dd   : > { %1841 = vst [vmem:[%s2698_s14 + $0x38] sm:$0xff] %v1825_v31 }
 0x4de   : > { %1848 = vst [vmem:[%s2698_s14 + $0x70] sm:$0xff] %v1832_v32 }
 0x4e0   : > { %v1815_v33 = vpop.f32.mrf.mxu3 }
 0x4e1   : > { %v1816_v34 = vadd.f32 %v1815_v33, %v1626_v61 }
 0x4e3   : > { %v1833_v35 = vmax.f32 %v1816_v34, 0.0 }
 0x4e5   : > { %1849 = vst [vmem:[%s2698_s14 + $0x78] sm:$0xff] %v1833_v35 }
 0x4e6   : > { %2248 = shalt.err (!%p2245_p8)
}
 0x4e7   : > { %s2302_s27 = smov 1024   ;;  %s2303_s30 = smov 64  }
 0x4e8   : > { %2052 = dma.vmem_to_hbm [thread:$0]  (%p2407_p5), %s1864_s16, 2048, %s1866_s17, %s1851_s25, %s2302_s27, %s2302_s27, %s2303_s30  }
 0x4e9 PF: > { %s2783_s14 = sld [smem:[#allocation12_spill]]  ;;  %p2074_p9 = scmp.ge.s32.totalorder %s2291_s24, 2 }
 0x4eb   : > { %p2065_p10 = pnand %p2074_p9, %p2411_p6 }
 0x4ed   : > { %p2066_p11 = pneg %p2065_p10 }
 0x4ef   : > { %s1880_s18 = sand.u32 1, %s2783_s14  }
 0x4f0   : > { %s1881_s20 = scalar_lea.sflag [#allocation4], %s1880_s18 }
 0x4f1   : > { %2274 = dma.done.wait (%p2066_p11), %s1881_s20, 2048  }
 0x4f2   : > { %2276 = vsyncadd (%p2066_p11), %s1881_s20, 4294965248  ;;  %s2785_s24 = sld [smem:[#allocation14_spill]]  ;;  %s2788_s21 = smov %s2283_s22 }
 0x4f3   : > { %s2786_s26 = sld [smem:[#allocation13_spill]] }
 0x4f4   : > { %s2787_s23 = sld [smem:[#allocation15_spill]] }
 0x4f8   : > { %p24_p12 = scmp.ge.s32.totalorder %s2785_s24, 4  }
 0x4f9   : > { %s2789_s22 = smov %s2786_s26 }
 0x4fa   :  { %26 = sbr.rel (!%p24_p12) target bundleno = 8 (0x8), region = 119 }
 0x4ff   :  { %1887 = vsyncpa [#allocation3], 1 }
 0x500   :  { %1889 = vsyncpa [#allocation3 + $0x1], 1 }
 0x501   :  { %1890 = vsyncpa [#allocation6], 1 }
 0x502   :  { %1891 = vsyncpa [#allocation4], 1 }
 0x503   :  { %1893 = vsyncpa [#allocation4 + $0x1], 1 }

</bundles_post_ra>
